<compile_context>
chip_gen: v6e
topology: v6e:2x2x1
jax: 0.10.0
libtpu: 0.0.40
codegen_flags: <defaults>
</compile_context>

<pallas_src>
import jax
import jax.numpy as jnp
from jax import lax
from jax.experimental import pallas as pl
from jax.experimental.pallas import tpu as pltpu  # noqa: F401  (TPU backend)

OC_PAD = 128  # padded channel width / FC width (lane dimension)


# ---------------------------------------------------------------------------
# Pallas kernels
# ---------------------------------------------------------------------------
def conv_relu_pool_kernel(a_ref, w_ref, b_ref, o_ref):
    """a:(4, M, Kp) = one im2col patch matrix per 2x2 pool offset.
    o = relu(max_d(a[d] @ w) + b) == maxpool2x2(relu(conv(x) + b))."""
    w = w_ref[...]                                   # hold RHS across 4 matmuls
    m = jnp.dot(a_ref[0], w, preferred_element_type=jnp.float32)
    for d in range(1, 4):
        m = jnp.maximum(m, jnp.dot(a_ref[d], w,
                                   preferred_element_type=jnp.float32))
    o_ref[...] = jnp.maximum(m + b_ref[...], 0.0)


def fc_stack_kernel(x_ref, w1_ref, b1_ref, w2_ref, b2_ref, w3_ref, b3_ref,
                    o_ref):
    """Fused linear1+ReLU, linear2+ReLU, linear3 — intermediates never leave
    VMEM/registers (removes 2 launches + 2 HBM round trips)."""
    h = jnp.dot(x_ref[...], w1_ref[...],
                preferred_element_type=jnp.float32) + b1_ref[...]
    h = jnp.maximum(h, 0.0)
    h = jnp.dot(h, w2_ref[...],
                preferred_element_type=jnp.float32) + b2_ref[...]
    h = jnp.maximum(h, 0.0)
    o_ref[...] = jnp.dot(h, w3_ref[...],
                         preferred_element_type=jnp.float32) + b3_ref[...]


# ---------------------------------------------------------------------------
# Pallas wrappers (whole-array blocks; all dims are (8,128)-aligned & tiny)
# ---------------------------------------------------------------------------
def conv_relu_pool(patches4, wmat, bias):
    _, M, Kp = patches4.shape
    Np = wmat.shape[1]
    return pl.pallas_call(
        conv_relu_pool_kernel,
        out_shape=jax.ShapeDtypeStruct((M, Np), jnp.float32),
        in_specs=[
            pl.BlockSpec((4, M, Kp), lambda: (0, 0, 0)),
            pl.BlockSpec((Kp, Np), lambda: (0, 0)),
            pl.BlockSpec((1, Np), lambda: (0, 0)),
        ],
        out_specs=pl.BlockSpec((M, Np), lambda: (0, 0)),
    )(patches4, wmat, bias)


def fc_stack(x, w1, b1, w2, b2, w3, b3):
    M, K = x.shape
    N1, N2, N3 = w1.shape[1], w2.shape[1], w3.shape[1]
    return pl.pallas_call(
        fc_stack_kernel,
        out_shape=jax.ShapeDtypeStruct((M, N3), jnp.float32),
        in_specs=[
            pl.BlockSpec((M, K), lambda: (0, 0)),
            pl.BlockSpec((K, N1), lambda: (0, 0)),
            pl.BlockSpec((1, N1), lambda: (0, 0)),
            pl.BlockSpec((N1, N2), lambda: (0, 0)),
            pl.BlockSpec((1, N2), lambda: (0, 0)),
            pl.BlockSpec((N2, N3), lambda: (0, 0)),
            pl.BlockSpec((1, N3), lambda: (0, 0)),
        ],
        out_specs=pl.BlockSpec((M, N3), lambda: (0, 0)),
    )(x, w1, b1, w2, b2, w3, b3)


# ---------------------------------------------------------------------------
# Host-side im2col that also splits the 4 pooling offsets (tiny XLA glue)
# ---------------------------------------------------------------------------
def im2col_pool(x, ksize, k_pad):
    """x: (N, H, W, C) NHWC.  Returns the four pool-offset im2col patch
    matrices stacked as (4, N*Ho*Wo, k_pad), feature order (ki, kj, c),
    zero-padded along K to k_pad."""
    N, H, W, C = x.shape
    OH, OW = H - ksize + 1, W - ksize + 1
    Ho, Wo = OH // 2, OW // 2
    cols = [x[:, i:i + OH, j:j + OW, :]
            for i in range(ksize) for j in range(ksize)]
    p = jnp.stack(cols, axis=3).reshape(N, OH, OW, ksize * ksize * C)
    p4 = jnp.stack([p[:, 0::2, 0::2, :], p[:, 0::2, 1::2, :],
                    p[:, 1::2, 0::2, :], p[:, 1::2, 1::2, :]], axis=0)
    p4 = p4.reshape(4, N * Ho * Wo, ksize * ksize * C)
    p4 = jnp.pad(p4, ((0, 0), (0, 0), (0, k_pad - ksize * ksize * C)))
    return p4, (N, Ho, Wo)


# ---------------------------------------------------------------------------
# Parameters (torch layout) + one-time prep into padded / pre-transposed form
# ---------------------------------------------------------------------------
def init_lenet_params(key, in_channels=1, out_channels=10):
    def uniform(key, shape, fan_in):
        bound = 1.0 / jnp.sqrt(jnp.float32(fan_in))
        return jax.random.uniform(key, shape, jnp.float32, -bound, bound)

    ks = jax.random.split(key, 10)
    p = {}
    p["w1"] = uniform(ks[0], (6, in_channels, 5, 5), in_channels * 25)
    p["b1"] = uniform(ks[1], (6,), in_channels * 25)
    p["w2"] = uniform(ks[2], (16, 6, 5, 5), 6 * 25)
    p["b2"] = uniform(ks[3], (16,), 6 * 25)
    p["wl1"] = uniform(ks[4], (120, 16 * 4 * 4), 16 * 4 * 4)   # torch (out, in)
    p["bl1"] = uniform(ks[5], (120,), 16 * 4 * 4)
    p["wl2"] = uniform(ks[6], (84, 120), 120)
    p["bl2"] = uniform(ks[7], (84,), 120)
    p["wl3"] = uniform(ks[8], (out_channels, 84), 84)
    p["bl3"] = uniform(ks[9], (out_channels,), 84)
    return p


def prepare_params(p):
    """One-time weight prep: transpose / reshape / zero-pad every operand so
    all Pallas GEMMs are lane-dense; no per-forward weight transposes."""
    def pad_to(a, shape):
        return jnp.pad(a, [(0, s - d) for d, s in zip(a.shape, shape)])

    def round_up(x, m):
        return ((x + m - 1) // m) * m

    def conv_w(w, b):
        oc, c, k, _ = w.shape
        kk = k * k * c
        wm = jnp.transpose(w, (2, 3, 1, 0)).reshape(kk, oc)  # rows: (ki,kj,c)
        return (pad_to(wm, (round_up(kk, 128), OC_PAD)),
                pad_to(b.reshape(1, oc), (1, OC_PAD)))

    pp = {}
    pp["w1c"], pp["b1c"] = conv_w(p["w1"], p["b1"])           # (128,128),(1,128)
    pp["w2c"], pp["b2c"] = conv_w(p["w2"], p["b2"])           # (256,128),(1,128)

    # fc1: bake torch's channel-major flatten AND the conv2 channel padding
    # into the weight: rows ordered (h, w, c_pad) so the padded NHWC conv2
    # output can be flattened as-is (no activation transpose).
    o1 = p["wl1"].shape[0]
    w = p["wl1"].reshape(o1, 16, 4, 4).transpose(2, 3, 1, 0)  # (4,4,16,o1)
    w = jnp.pad(w, ((0, 0), (0, 0), (0, OC_PAD - 16), (0, OC_PAD - o1)))
    pp["w1f"] = w.reshape(4 * 4 * OC_PAD, OC_PAD)             # (2048,128)
    pp["b1f"] = pad_to(p["bl1"].reshape(1, o1), (1, OC_PAD))

    o2 = p["wl2"].shape[0]
    pp["w2f"] = pad_to(p["wl2"].T, (OC_PAD, OC_PAD))
    pp["b2f"] = pad_to(p["bl2"].reshape(1, o2), (1, OC_PAD))

    o3 = p["wl3"].shape[0]
    pp["w3f"] = pad_to(p["wl3"].T, (OC_PAD, OC_PAD))
    pp["b3f"] = pad_to(p["bl3"].reshape(1, o3), (1, OC_PAD))
    return pp


# ---------------------------------------------------------------------------
# Forward
# ---------------------------------------------------------------------------
def lenet_forward(x, pp, *, out_channels=10):
    """x: (N, C_in, 28, 28) NCHW (torch convention). Returns (N, out_channels)."""
    N = x.shape[0]
    x = jnp.transpose(x, (0, 2, 3, 1))                    # NHWC, once, up front

    # conv1 + ReLU + MaxPool2d(2)   (single fused pallas_call)
    p1, (_, ho1, wo1) = im2col_pool(x, 5, pp["w1c"].shape[0])
    y1 = conv_relu_pool(p1, pp["w1c"], pp["b1c"])         # (N*12*12, 128)
    y1 = y1.reshape(N, ho1, wo1, OC_PAD)[..., :6]         # conv1 has 6 channels

    # conv2 + ReLU + MaxPool2d(2, 2)   (single fused pallas_call)
    p2, (_, ho2, wo2) = im2col_pool(y1, 5, pp["w2c"].shape[0])
    y2 = conv_relu_pool(p2, pp["w2c"], pp["b2c"])         # (N*4*4, 128)

    # flatten: torch's channel-major .view permutation is pre-baked into w1f,
    # so the padded NHWC activation flattens as-is.  Pad batch -> 8 sublanes.
    feat = y2.reshape(N, ho2 * wo2 * OC_PAD)              # (N, 2048)
    mp = max(8, ((N + 7) // 8) * 8)
    feat = jnp.pad(feat, ((0, mp - N), (0, 0)))

    out = fc_stack(feat, pp["w1f"], pp["b1f"], pp["w2f"], pp["b2f"],
                   pp["w3f"], pp["b3f"])                  # (mp, 128)
    return out[:N, :out_channels]


# ---------------------------------------------------------------------------
# Pure-JAX reference (for correctness check only)
# ---------------------------------------------------------------------------
def lenet_reference(x, p):
    def conv_relu(x, w, b):
        y = lax.conv_general_dilated(
            x, w, window_strides=(1, 1), padding="VALID",
            dimension_numbers=("NCHW", "OIHW", "NCHW"))
        return jax.nn.relu(y + b.reshape(1, -1, 1, 1))

    def pool(x):
        return lax.reduce_window(x, -jnp.inf, lax.max,
                                 (1, 1, 2, 2), (1, 1, 2, 2), "VALID")

    with jax.default_matmul_precision("highest"):
        x = pool(conv_relu(x, p["w1"], p["b1"]))
        x = pool(conv_relu(x, p["w2"], p["b2"]))
        x = x.reshape(x.shape[0], -1)
        x = jax.nn.relu(x @ p["wl1"].T + p["bl1"])
        x = jax.nn.relu(x @ p["wl2"].T + p["bl2"])
        return x @ p["wl3"].T + p["bl3"]


if __name__ == "__main__":
    key = jax.random.PRNGKey(0)
    pkey, xkey = jax.random.split(key)
    params = init_lenet_params(pkey, in_channels=1, out_channels=10)
    prepped = prepare_params(params)   # one-time weight transpose/pad

    # LeNet's 16*4*4 flatten hard-codes 28x28 inputs (MNIST-sized).
    x = jax.random.normal(xkey, (2, 1, 28, 28), jnp.float32)

    fwd = jax.jit(lenet_forward)
    out = jax.block_until_ready(fwd(x, prepped))
    assert out.shape == (2, 10), out.shape

    ref = jax.block_until_ready(jax.jit(lenet_reference)(x, params))
    err = float(jnp.max(jnp.abs(out - ref)))
    assert err < 5e-2, f"max abs error vs reference: {err}"

    print("KERNEL_OK")
</pallas_src>

<mosaic_0001>
module attributes {stable_mosaic.version = 11 : i64} {
  func.func @conv_relu_pool_kernel(%arg0: memref<4x288x128xf32, #tpu.memory_space<vmem>>, %arg1: memref<128x128xf32, #tpu.memory_space<vmem>>, %arg2: memref<1x128xf32, #tpu.memory_space<vmem>>, %arg3: memref<288x128xf32, #tpu.memory_space<vmem>>) attributes {dimension_semantics = [], scalar_prefetch = 0 : i64, scratch_operands = 0 : i64, tpu.core_type = #tpu.core_type<tc>} {
    %c0 = arith.constant 0 : index
    %c0_0 = arith.constant 0 : index
    %0 = vector.load %arg1[%c0, %c0_0] : memref<128x128xf32, #tpu.memory_space<vmem>>, vector<128x128xf32>
    %c0_1 = arith.constant 0 : index
    %c0_2 = arith.constant 0 : index
    %c0_3 = arith.constant 0 : index
    %1 = vector.load %arg0[%c0_1, %c0_2, %c0_3] : memref<4x288x128xf32, #tpu.memory_space<vmem>>, vector<1x288x128xf32>
    %2 = vector.shape_cast %1 : vector<1x288x128xf32> to vector<288x128xf32>
    %cst = arith.constant dense<0.000000e+00> : vector<288x128xf32>
    %3 = tpu.matmul %2, %0, %cst {dimension_numbers = #tpu.dot_dimension_numbers<[1], [0], [0], [1], [0, 0, 1, 1], [], []>} : vector<288x128xf32>, vector<128x128xf32>, vector<288x128xf32> -> vector<288x128xf32>
    %c1 = arith.constant 1 : index
    %c0_4 = arith.constant 0 : index
    %c0_5 = arith.constant 0 : index
    %4 = vector.load %arg0[%c1, %c0_4, %c0_5] : memref<4x288x128xf32, #tpu.memory_space<vmem>>, vector<1x288x128xf32>
    %5 = vector.shape_cast %4 : vector<1x288x128xf32> to vector<288x128xf32>
    %cst_6 = arith.constant dense<0.000000e+00> : vector<288x128xf32>
    %6 = tpu.matmul %5, %0, %cst_6 {dimension_numbers = #tpu.dot_dimension_numbers<[1], [0], [0], [1], [0, 0, 1, 1], [], []>} : vector<288x128xf32>, vector<128x128xf32>, vector<288x128xf32> -> vector<288x128xf32>
    %7 = arith.maximumf %3, %6 : vector<288x128xf32>
    %c2 = arith.constant 2 : index
    %c0_7 = arith.constant 0 : index
    %c0_8 = arith.constant 0 : index
    %8 = vector.load %arg0[%c2, %c0_7, %c0_8] : memref<4x288x128xf32, #tpu.memory_space<vmem>>, vector<1x288x128xf32>
    %9 = vector.shape_cast %8 : vector<1x288x128xf32> to vector<288x128xf32>
    %cst_9 = arith.constant dense<0.000000e+00> : vector<288x128xf32>
    %10 = tpu.matmul %9, %0, %cst_9 {dimension_numbers = #tpu.dot_dimension_numbers<[1], [0], [0], [1], [0, 0, 1, 1], [], []>} : vector<288x128xf32>, vector<128x128xf32>, vector<288x128xf32> -> vector<288x128xf32>
    %11 = arith.maximumf %7, %10 : vector<288x128xf32>
    %c3 = arith.constant 3 : index
    %c0_10 = arith.constant 0 : index
    %c0_11 = arith.constant 0 : index
    %12 = vector.load %arg0[%c3, %c0_10, %c0_11] : memref<4x288x128xf32, #tpu.memory_space<vmem>>, vector<1x288x128xf32>
    %13 = vector.shape_cast %12 : vector<1x288x128xf32> to vector<288x128xf32>
    %cst_12 = arith.constant dense<0.000000e+00> : vector<288x128xf32>
    %14 = tpu.matmul %13, %0, %cst_12 {dimension_numbers = #tpu.dot_dimension_numbers<[1], [0], [0], [1], [0, 0, 1, 1], [], []>} : vector<288x128xf32>, vector<128x128xf32>, vector<288x128xf32> -> vector<288x128xf32>
    %15 = arith.maximumf %11, %14 : vector<288x128xf32>
    %c0_13 = arith.constant 0 : index
    %c0_14 = arith.constant 0 : index
    %16 = vector.load %arg2[%c0_13, %c0_14] : memref<1x128xf32, #tpu.memory_space<vmem>>, vector<1x128xf32>
    %17 = vector.broadcast %16 : vector<1x128xf32> to vector<288x128xf32>
    %18 = arith.addf %15, %17 : vector<288x128xf32>
    %cst_15 = arith.constant 0.000000e+00 : f32
    %19 = vector.broadcast %cst_15 : f32 to vector<288x128xf32>
    %20 = arith.maximumf %18, %19 : vector<288x128xf32>
    %c0_16 = arith.constant 0 : index
    %c0_17 = arith.constant 0 : index
    %21 = vector.load %arg3[%c0_16, %c0_17] : memref<288x128xf32, #tpu.memory_space<vmem>>, vector<288x128xf32>
    tpu.vector_store %arg3[%c0_16, %c0_17], %20 {strides = array<i32>} : memref<288x128xf32, #tpu.memory_space<vmem>>, vector<288x128xf32>,
    return
  }
}

module attributes {stable_mosaic.version = 11 : i64} {
  func.func @fc_stack_kernel(%arg0: memref<8x2048xf32, #tpu.memory_space<vmem>>, %arg1: memref<2048x128xf32, #tpu.memory_space<vmem>>, %arg2: memref<1x128xf32, #tpu.memory_space<vmem>>, %arg3: memref<128x128xf32, #tpu.memory_space<vmem>>, %arg4: memref<1x128xf32, #tpu.memory_space<vmem>>, %arg5: memref<128x128xf32, #tpu.memory_space<vmem>>, %arg6: memref<1x128xf32, #tpu.memory_space<vmem>>, %arg7: memref<8x128xf32, #tpu.memory_space<vmem>>) attributes {dimension_semantics = [], scalar_prefetch = 0 : i64, scratch_operands = 0 : i64, tpu.core_type = #tpu.core_type<tc>} {
    %c0 = arith.constant 0 : index
    %c0_0 = arith.constant 0 : index
    %0 = vector.load %arg0[%c0, %c0_0] : memref<8x2048xf32, #tpu.memory_space<vmem>>, vector<8x2048xf32>
    %c0_1 = arith.constant 0 : index
    %c0_2 = arith.constant 0 : index
    %1 = vector.load %arg1[%c0_1, %c0_2] : memref<2048x128xf32, #tpu.memory_space<vmem>>, vector<2048x128xf32>
    %cst = arith.constant dense<0.000000e+00> : vector<8x128xf32>
    %2 = tpu.matmul %0, %1, %cst {dimension_numbers = #tpu.dot_dimension_numbers<[1], [0], [0], [1], [0, 0, 1, 1], [], []>} : vector<8x2048xf32>, vector<2048x128xf32>, vector<8x128xf32> -> vector<8x128xf32>
    %c0_3 = arith.constant 0 : index
    %c0_4 = arith.constant 0 : index
    %3 = vector.load %arg2[%c0_3, %c0_4] : memref<1x128xf32, #tpu.memory_space<vmem>>, vector<1x128xf32>
    %4 = vector.broadcast %3 : vector<1x128xf32> to vector<8x128xf32>
    %5 = arith.addf %2, %4 : vector<8x128xf32>
    %cst_5 = arith.constant 0.000000e+00 : f32
    %6 = vector.broadcast %cst_5 : f32 to vector<8x128xf32>
    %7 = arith.maximumf %5, %6 : vector<8x128xf32>
    %c0_6 = arith.constant 0 : index
    %c0_7 = arith.constant 0 : index
    %8 = vector.load %arg3[%c0_6, %c0_7] : memref<128x128xf32, #tpu.memory_space<vmem>>, vector<128x128xf32>
    %cst_8 = arith.constant dense<0.000000e+00> : vector<8x128xf32>
    %9 = tpu.matmul %7, %8, %cst_8 {dimension_numbers = #tpu.dot_dimension_numbers<[1], [0], [0], [1], [0, 0, 1, 1], [], []>} : vector<8x128xf32>, vector<128x128xf32>, vector<8x128xf32> -> vector<8x128xf32>
    %c0_9 = arith.constant 0 : index
    %c0_10 = arith.constant 0 : index
    %10 = vector.load %arg4[%c0_9, %c0_10] : memref<1x128xf32, #tpu.memory_space<vmem>>, vector<1x128xf32>
    %11 = vector.broadcast %10 : vector<1x128xf32> to vector<8x128xf32>
    %12 = arith.addf %9, %11 : vector<8x128xf32>
    %cst_11 = arith.constant 0.000000e+00 : f32
    %13 = vector.broadcast %cst_11 : f32 to vector<8x128xf32>
    %14 = arith.maximumf %12, %13 : vector<8x128xf32>
    %c0_12 = arith.constant 0 : index
    %c0_13 = arith.constant 0 : index
    %15 = vector.load %arg5[%c0_12, %c0_13] : memref<128x128xf32, #tpu.memory_space<vmem>>, vector<128x128xf32>
    %cst_14 = arith.constant dense<0.000000e+00> : vector<8x128xf32>
    %16 = tpu.matmul %14, %15, %cst_14 {dimension_numbers = #tpu.dot_dimension_numbers<[1], [0], [0], [1], [0, 0, 1, 1], [], []>} : vector<8x128xf32>, vector<128x128xf32>, vector<8x128xf32> -> vector<8x128xf32>
    %c0_15 = arith.constant 0 : index
    %c0_16 = arith.constant 0 : index
    %17 = vector.load %arg6[%c0_15, %c0_16] : memref<1x128xf32, #tpu.memory_space<vmem>>, vector<1x128xf32>
    %18 = vector.broadcast %17 : vector<1x128xf32> to vector<8x128xf32>
    %19 = arith.addf %16, %18 : vector<8x128xf32>
    %c0_17 = arith.constant 0 : index
    %c0_18 = arith.constant 0 : index
    %20 = vector.load %arg7[%c0_17, %c0_18] : memref<8x128xf32, #tpu.memory_space<vmem>>, vector<8x128xf32>
    tpu.vector_store %arg7[%c0_17, %c0_18], %19 {strides = array<i32>} : memref<8x128xf32, #tpu.memory_space<vmem>>, vector<8x128xf32>,
    return
  }
}

module attributes {stable_mosaic.version = 11 : i64} {
  func.func @conv_relu_pool_kernel(%arg0: memref<4x32x256xf32, #tpu.memory_space<vmem>>, %arg1: memref<256x128xf32, #tpu.memory_space<vmem>>, %arg2: memref<1x128xf32, #tpu.memory_space<vmem>>, %arg3: memref<32x128xf32, #tpu.memory_space<vmem>>) attributes {dimension_semantics = [], scalar_prefetch = 0 : i64, scratch_operands = 0 : i64, tpu.core_type = #tpu.core_type<tc>} {
    %c0 = arith.constant 0 : index
    %c0_0 = arith.constant 0 : index
    %0 = vector.load %arg1[%c0, %c0_0] : memref<256x128xf32, #tpu.memory_space<vmem>>, vector<256x128xf32>
    %c0_1 = arith.constant 0 : index
    %c0_2 = arith.constant 0 : index
    %c0_3 = arith.constant 0 : index
    %1 = vector.load %arg0[%c0_1, %c0_2, %c0_3] : memref<4x32x256xf32, #tpu.memory_space<vmem>>, vector<1x32x256xf32>
    %2 = vector.shape_cast %1 : vector<1x32x256xf32> to vector<32x256xf32>
    %cst = arith.constant dense<0.000000e+00> : vector<32x128xf32>
    %3 = tpu.matmul %2, %0, %cst {dimension_numbers = #tpu.dot_dimension_numbers<[1], [0], [0], [1], [0, 0, 1, 1], [], []>} : vector<32x256xf32>, vector<256x128xf32>, vector<32x128xf32> -> vector<32x128xf32>
    %c1 = arith.constant 1 : index
    %c0_4 = arith.constant 0 : index
    %c0_5 = arith.constant 0 : index
    %4 = vector.load %arg0[%c1, %c0_4, %c0_5] : memref<4x32x256xf32, #tpu.memory_space<vmem>>, vector<1x32x256xf32>
    %5 = vector.shape_cast %4 : vector<1x32x256xf32> to vector<32x256xf32>
    %cst_6 = arith.constant dense<0.000000e+00> : vector<32x128xf32>
    %6 = tpu.matmul %5, %0, %cst_6 {dimension_numbers = #tpu.dot_dimension_numbers<[1], [0], [0], [1], [0, 0, 1, 1], [], []>} : vector<32x256xf32>, vector<256x128xf32>, vector<32x128xf32> -> vector<32x128xf32>
    %7 = arith.maximumf %3, %6 : vector<32x128xf32>
    %c2 = arith.constant 2 : index
    %c0_7 = arith.constant 0 : index
    %c0_8 = arith.constant 0 : index
    %8 = vector.load %arg0[%c2, %c0_7, %c0_8] : memref<4x32x256xf32, #tpu.memory_space<vmem>>, vector<1x32x256xf32>
    %9 = vector.shape_cast %8 : vector<1x32x256xf32> to vector<32x256xf32>
    %cst_9 = arith.constant dense<0.000000e+00> : vector<32x128xf32>
    %10 = tpu.matmul %9, %0, %cst_9 {dimension_numbers = #tpu.dot_dimension_numbers<[1], [0], [0], [1], [0, 0, 1, 1], [], []>} : vector<32x256xf32>, vector<256x128xf32>, vector<32x128xf32> -> vector<32x128xf32>
    %11 = arith.maximumf %7, %10 : vector<32x128xf32>
    %c3 = arith.constant 3 : index
    %c0_10 = arith.constant 0 : index
    %c0_11 = arith.constant 0 : index
    %12 = vector.load %arg0[%c3, %c0_10, %c0_11] : memref<4x32x256xf32, #tpu.memory_space<vmem>>, vector<1x32x256xf32>
    %13 = vector.shape_cast %12 : vector<1x32x256xf32> to vector<32x256xf32>
    %cst_12 = arith.constant dense<0.000000e+00> : vector<32x128xf32>
    %14 = tpu.matmul %13, %0, %cst_12 {dimension_numbers = #tpu.dot_dimension_numbers<[1], [0], [0], [1], [0, 0, 1, 1], [], []>} : vector<32x256xf32>, vector<256x128xf32>, vector<32x128xf32> -> vector<32x128xf32>
    %15 = arith.maximumf %11, %14 : vector<32x128xf32>
    %c0_13 = arith.constant 0 : index
    %c0_14 = arith.constant 0 : index
    %16 = vector.load %arg2[%c0_13, %c0_14] : memref<1x128xf32, #tpu.memory_space<vmem>>, vector<1x128xf32>
    %17 = vector.broadcast %16 : vector<1x128xf32> to vector<32x128xf32>
    %18 = arith.addf %15, %17 : vector<32x128xf32>
    %cst_15 = arith.constant 0.000000e+00 : f32
    %19 = vector.broadcast %cst_15 : f32 to vector<32x128xf32>
    %20 = arith.maximumf %18, %19 : vector<32x128xf32>
    %c0_16 = arith.constant 0 : index
    %c0_17 = arith.constant 0 : index
    %21 = vector.load %arg3[%c0_16, %c0_17] : memref<32x128xf32, #tpu.memory_space<vmem>>, vector<32x128xf32>
    tpu.vector_store %arg3[%c0_16, %c0_17], %20 {strides = array<i32>} : memref<32x128xf32, #tpu.memory_space<vmem>>, vector<32x128xf32>,
    return
  }
}

</mosaic_0001>

<bundles_post_ra>
// kernel: lenet_forward.3
= control target key start
LH: loop header
LB: loop body
LE: loop exit
PB: predicated region body
PF: predicated region fallthrough
CT: control target
= control target key end

     0   :  { %s3178_s1 = inlined_call_operand.vmem [shape: f32[128,128], index: 1, kind: input, shape index: {}]   ;;  %s3179_s0 = inlined_call_operand.vmem [shape: f32[4,288,128], index: 0, kind: input, shape index: {}]   ;;  %s3180_s2 = inlined_call_operand.vmem [shape: f32[1,128], index: 2, kind: input, shape index: {}]   ;;  %s3181_s3 = inlined_call_operand.vmem [shape: f32[288,128], index: 3, kind: output, shape index: {}]  }
   0x1   :  { %v2068_v0 = vld [vmem:[%s3178_s1 + $0x78] sm:$0xff]  ;;  %v2073_v1 = vld [vmem:[%s3178_s1 + $0x70] sm:$0xff]  ;;  %v2082_v2 = vld [vmem:[%s3178_s1 + $0x68] sm:$0xff] }
   0x2   :  { %1701 = vmatprep.subr.mxu0 %v2068_v0  ;;  %1787 = vmatprep.subr.mxu1 %v2068_v0  ;;  %v2091_v3 = vld [vmem:[%s3178_s1 + $0x60] sm:$0xff]  ;;  %v2100_v4 = vld [vmem:[%s3178_s1 + $0x58] sm:$0xff]  ;;  %v2109_v5 = vld [vmem:[%s3178_s1 + $0x50] sm:$0xff] }
   0x3   :  { %1702 = vmatpush3.msra.mxu0 %v2068_v0  ;;  %1788 = vmatpush3.msra.mxu1 %v2068_v0  ;;  %v2118_v6 = vld [vmem:[%s3178_s1 + $0x48] sm:$0xff]  ;;  %v2127_v7 = vld [vmem:[%s3178_s1 + $0x40] sm:$0xff]  ;;  %v2136_v8 = vld [vmem:[%s3178_s1 + $0x38] sm:$0xff] }
   0x4   :  { %1703 = vmatprep.subr.mxu0 %v2073_v1  ;;  %1789 = vmatprep.subr.mxu1 %v2073_v1  ;;  %v2145_v9 = vld [vmem:[%s3178_s1 + $0x30] sm:$0xff]  ;;  %v2154_v10 = vld [vmem:[%s3178_s1 + $0x28] sm:$0xff]  ;;  %v2163_v11 = vld [vmem:[%s3178_s1 + $0x20] sm:$0xff] }
   0x5   :  { %1704 = vmatpush3.msra.mxu0 %v2073_v1  ;;  %1790 = vmatpush3.msra.mxu1 %v2073_v1  ;;  %v2172_v12 = vld [vmem:[%s3178_s1 + $0x18] sm:$0xff]  ;;  %v2181_v13 = vld [vmem:[%s3178_s1 + $0x10] sm:$0xff]  ;;  %v2190_v14 = vld [vmem:[%s3178_s1 + $0x8] sm:$0xff] }
   0x6   :  { %1705 = vmatprep.subr.mxu0 %v2082_v2  ;;  %1791 = vmatprep.subr.mxu1 %v2082_v2  ;;  %v2199_v15 = vld [vmem:[%s3178_s1] sm:$0xff]  ;;  %v31_v18 = vld [vmem:[%s3179_s0 + $0x8] sm:$0xff]  ;;  %v32_v20 = vld [vmem:[%s3179_s0 + $0x10] sm:$0xff] }
   0x7   :  { %1706 = vmatpush3.msra.mxu0 %v2082_v2  ;;  %1792 = vmatpush3.msra.mxu1 %v2082_v2  ;;  %v30_v16 = vld [vmem:[%s3179_s0] sm:$0xff]  ;;  %v1385_v19 = vld [vmem:[%s3179_s0 + $0x128] sm:$0xff]  ;;  %v1386_v21 = vld [vmem:[%s3179_s0 + $0x130] sm:$0xff] }
   0x8   :  { %1707 = vmatprep.subr.mxu0 %v2091_v3  ;;  %1793 = vmatprep.subr.mxu1 %v2091_v3  ;;  %v1384_v17 = vld [vmem:[%s3179_s0 + $0x120] sm:$0xff]  ;;  %v33_v22 = vld [vmem:[%s3179_s0 + $0x18] sm:$0xff]  ;;  %v35_v26 = vld [vmem:[%s3179_s0 + $0x28] sm:$0xff] }
   0x9   :  { %1708 = vmatpush3.msra.mxu0 %v2091_v3  ;;  %1794 = vmatpush3.msra.mxu1 %v2091_v3  ;;  %v1387_v23 = vld [vmem:[%s3179_s0 + $0x138] sm:$0xff]  ;;  %v34_v24 = vld [vmem:[%s3179_s0 + $0x20] sm:$0xff]  ;;  %v1389_v27 = vld [vmem:[%s3179_s0 + $0x148] sm:$0xff] }
   0xa   :  { %1709 = vmatprep.subr.mxu0 %v2100_v4  ;;  %1795 = vmatprep.subr.mxu1 %v2100_v4  ;;  %v1388_v25 = vld [vmem:[%s3179_s0 + $0x140] sm:$0xff]  ;;  %v36_v28 = vld [vmem:[%s3179_s0 + $0x30] sm:$0xff]  ;;  %v37_v30 = vld [vmem:[%s3179_s0 + $0x38] sm:$0xff] }
   0xb   :  { %1710 = vmatpush3.msra.mxu0 %v2100_v4  ;;  %1796 = vmatpush3.msra.mxu1 %v2100_v4  ;;  %v1390_v29 = vld [vmem:[%s3179_s0 + $0x150] sm:$0xff]  ;;  %v1391_v31 = vld [vmem:[%s3179_s0 + $0x158] sm:$0xff]  ;;  %v38_v32 = vld [vmem:[%s3179_s0 + $0x40] sm:$0xff] }
   0xc   :  { %1711 = vmatprep.subr.mxu0 %v2109_v5  ;;  %1797 = vmatprep.subr.mxu1 %v2109_v5  ;;  %v1392_v33 = vld [vmem:[%s3179_s0 + $0x160] sm:$0xff]  ;;  %v39_v34 = vld [vmem:[%s3179_s0 + $0x48] sm:$0xff]  ;;  %v40_v36 = vld [vmem:[%s3179_s0 + $0x50] sm:$0xff] }
   0xd   :  { %1712 = vmatpush3.msra.mxu0 %v2109_v5  ;;  %1798 = vmatpush3.msra.mxu1 %v2109_v5  ;;  %v1393_v35 = vld [vmem:[%s3179_s0 + $0x168] sm:$0xff]  ;;  %v1394_v37 = vld [vmem:[%s3179_s0 + $0x170] sm:$0xff]  ;;  %v41_v38 = vld [vmem:[%s3179_s0 + $0x58] sm:$0xff] }
   0xe   :  { %1713 = vmatprep.subr.mxu0 %v2118_v6  ;;  %1799 = vmatprep.subr.mxu1 %v2118_v6  ;;  %v1395_v39 = vld [vmem:[%s3179_s0 + $0x178] sm:$0xff]  ;;  %v42_v40 = vld [vmem:[%s3179_s0 + $0x60] sm:$0xff]  ;;  %v43_v42 = vld [vmem:[%s3179_s0 + $0x68] sm:$0xff] }
   0xf   :  { %1714 = vmatpush3.msra.mxu0 %v2118_v6  ;;  %1800 = vmatpush3.msra.mxu1 %v2118_v6  ;;  %v1396_v41 = vld [vmem:[%s3179_s0 + $0x180] sm:$0xff]  ;;  %v1397_v43 = vld [vmem:[%s3179_s0 + $0x188] sm:$0xff]  ;;  %v44_v44 = vld [vmem:[%s3179_s0 + $0x70] sm:$0xff] }
  0x10   :  { %1715 = vmatprep.subr.mxu0 %v2127_v7  ;;  %1801 = vmatprep.subr.mxu1 %v2127_v7  ;;  %v1398_v45 = vld [vmem:[%s3179_s0 + $0x190] sm:$0xff]  ;;  %v45_v46 = vld [vmem:[%s3179_s0 + $0x78] sm:$0xff]  ;;  %v46_v48 = vld [vmem:[%s3179_s0 + $0x80] sm:$0xff] }
  0x11   :  { %1716 = vmatpush3.msra.mxu0 %v2127_v7  ;;  %1802 = vmatpush3.msra.mxu1 %v2127_v7  ;;  %v1399_v47 = vld [vmem:[%s3179_s0 + $0x198] sm:$0xff]  ;;  %v1400_v49 = vld [vmem:[%s3179_s0 + $0x1a0] sm:$0xff]  ;;  %v47_v50 = vld [vmem:[%s3179_s0 + $0x88] sm:$0xff] }
  0x12   :  { %1717 = vmatprep.subr.mxu0 %v2136_v8  ;;  %1803 = vmatprep.subr.mxu1 %v2136_v8  ;;  %v1401_v51 = vld [vmem:[%s3179_s0 + $0x1a8] sm:$0xff]  ;;  %v48_v52 = vld [vmem:[%s3179_s0 + $0x90] sm:$0xff]  ;;  %v49_v54 = vld [vmem:[%s3179_s0 + $0x98] sm:$0xff] }
  0x13   :  { %1718 = vmatpush3.msra.mxu0 %v2136_v8  ;;  %1804 = vmatpush3.msra.mxu1 %v2136_v8  ;;  %v1402_v53 = vld [vmem:[%s3179_s0 + $0x1b0] sm:$0xff]  ;;  %v1403_v55 = vld [vmem:[%s3179_s0 + $0x1b8] sm:$0xff]  ;;  %v50_v56 = vld [vmem:[%s3179_s0 + $0xa0] sm:$0xff] }
  0x14   :  { %1719 = vmatprep.subr.mxu0 %v2145_v9  ;;  %1805 = vmatprep.subr.mxu1 %v2145_v9  ;;  %v1404_v57 = vld [vmem:[%s3179_s0 + $0x1c0] sm:$0xff]  ;;  %v51_v58 = vld [vmem:[%s3179_s0 + $0xa8] sm:$0xff]  ;;  %v52_v60 = vld [vmem:[%s3179_s0 + $0xb0] sm:$0xff] }
  0x15   :  { %1720 = vmatpush3.msra.mxu0 %v2145_v9  ;;  %1806 = vmatpush3.msra.mxu1 %v2145_v9  ;;  %v1405_v59 = vld [vmem:[%s3179_s0 + $0x1c8] sm:$0xff]  ;;  %v1406_v61 = vld [vmem:[%s3179_s0 + $0x1d0] sm:$0xff]  ;;  %v53_v62 = vld [vmem:[%s3179_s0 + $0xb8] sm:$0xff] }
  0x16   :  { %1721 = vmatprep.subr.mxu0 %v2154_v10  ;;  %1807 = vmatprep.subr.mxu1 %v2154_v10  ;;  %v1407_v63 = vld [vmem:[%s3179_s0 + $0x1d8] sm:$0xff] }
  0x17   :  { %1722 = vmatpush3.msra.mxu0 %v2154_v10  ;;  %1808 = vmatpush3.msra.mxu1 %v2154_v10 }
  0x18   :  { %1723 = vmatprep.subr.mxu0 %v2163_v11  ;;  %1809 = vmatprep.subr.mxu1 %v2163_v11 }
  0x19   :  { %1724 = vmatpush3.msra.mxu0 %v2163_v11  ;;  %1810 = vmatpush3.msra.mxu1 %v2163_v11 }
  0x1a   :  { %1725 = vmatprep.subr.mxu0 %v2172_v12  ;;  %1811 = vmatprep.subr.mxu1 %v2172_v12 }
  0x1b   :  { %1726 = vmatpush3.msra.mxu0 %v2172_v12  ;;  %1812 = vmatpush3.msra.mxu1 %v2172_v12 }
  0x1c   :  { %1727 = vmatprep.subr.mxu0 %v2181_v13  ;;  %1813 = vmatprep.subr.mxu1 %v2181_v13 }
  0x1d   :  { %1728 = vmatpush3.msra.mxu0 %v2181_v13  ;;  %1814 = vmatpush3.msra.mxu1 %v2181_v13 }
  0x1e   :  { %1729 = vmatprep.subr.mxu0 %v2190_v14  ;;  %1815 = vmatprep.subr.mxu1 %v2190_v14 }
  0x1f   :  { %1730 = vmatpush3.msra.mxu0 %v2190_v14  ;;  %1816 = vmatpush3.msra.mxu1 %v2190_v14 }
  0x20   :  { %1731 = vmatprep.subr.mxu0 %v2199_v15  ;;  %1817 = vmatprep.subr.mxu1 %v2199_v15 }
  0x21   :  { %1732 = vmatpush3.msra.mxu0 %v2199_v15  ;;  %1733 = vmatprep.mubr.f32.mxu0 %v30_v16  ;;  %v60_v16 = vld [vmem:[%s3179_s0 + $0xf0] sm:$0xff] }
  0x22   :  { %1818 = vmatpush3.msra.mxu1 %v2199_v15  ;;  %1819 = vmatprep.mubr.f32.mxu1 %v1384_v17  ;;  %v1414_v17 = vld [vmem:[%s3179_s0 + $0x210] sm:$0xff] }
  0x23   :  { %1734 = vmatmul.mubr.f32.vlgmr.msra.gmra.mxu0 %v31_v18  ;;  %1820 = vmatmul.mubr.f32.vlgmr.msra.gmra.mxu1 %v1385_v19  ;;  %v1415_v18 = vld [vmem:[%s3179_s0 + $0x218] sm:$0xff]  ;;  %v62_v19 = vld [vmem:[%s3179_s0 + $0x100] sm:$0xff] }
  0x24   :  { %1873 = vmatprep.subr.mxu0 %v2068_v0  ;;  %1959 = vmatprep.subr.mxu1 %v2068_v0 }
  0x25   :  { %1874 = vmatpush3.msra.mxu0 %v2068_v0  ;;  %1736 = vmatprep.mubr.f32.mxu0 %v32_v20  ;;  %v1416_v20 = vld [vmem:[%s3179_s0 + $0x220] sm:$0xff] }
  0x26   :  { %1822 = vmatprep.mubr.f32.mxu1 %v1386_v21  ;;  %1960 = vmatpush3.msra.mxu1 %v2068_v0  ;;  %v54_v0 = vld [vmem:[%s3179_s0 + $0xc0] sm:$0xff]  ;;  %v1417_v21 = vld [vmem:[%s3179_s0 + $0x228] sm:$0xff] }
  0x27   :  { %1737 = vmatmul.mubr.f32.gmra.mxu0 %v33_v22  ;;  %1823 = vmatmul.mubr.f32.gmra.mxu1 %v1387_v23  ;;  %v64_v22 = vld [vmem:[%s3179_s0 + $0x110] sm:$0xff] }
  0x28   :  { %1875 = vmatprep.subr.mxu0 %v2073_v1  ;;  %1739 = vmatprep.mubr.f32.mxu0 %v34_v24  ;;  %v1418_v23 = vld [vmem:[%s3179_s0 + $0x230] sm:$0xff]  ;;  %v1419_v24 = vld [vmem:[%s3179_s0 + $0x238] sm:$0xff] }
  0x29   :  { %1876 = vmatpush3.msra.mxu0 %v2073_v1  ;;  %1825 = vmatprep.mubr.f32.mxu1 %v1388_v25  ;;  %v1420_v25 = vld [vmem:[%s3179_s0 + $0x240] sm:$0xff] }
  0x2a   :  { %1961 = vmatprep.subr.mxu1 %v2073_v1  ;;  %1877 = vmatprep.subr.mxu0 %v2082_v2 }
  0x2b   :  { %1740 = vmatmul.mubr.f32.gmra.mxu0 %v35_v26  ;;  %1826 = vmatmul.mubr.f32.gmra.mxu1 %v1389_v27  ;;  %v1456_v26 = vld [vmem:[%s3179_s0 + $0x360] sm:$0xff]  ;;  %v1421_v27 = vld [vmem:[%s3179_s0 + $0x248] sm:$0xff] }
  0x2c   :  { %1962 = vmatpush3.msra.mxu1 %v2073_v1  ;;  %1878 = vmatpush3.msra.mxu0 %v2082_v2  ;;  %v1408_v1 = vld [vmem:[%s3179_s0 + $0x1e0] sm:$0xff] }
  0x2d   :  { %1742 = vmatprep.mubr.f32.mxu0 %v36_v28  ;;  %1828 = vmatprep.mubr.f32.mxu1 %v1390_v29  ;;  %v1457_v28 = vld [vmem:[%s3179_s0 + $0x368] sm:$0xff]  ;;  %v1458_v29 = vld [vmem:[%s3179_s0 + $0x370] sm:$0xff] }
  0x2e   :  { %1963 = vmatprep.subr.mxu1 %v2082_v2  ;;  %1879 = vmatprep.subr.mxu0 %v2091_v3 }
  0x2f   :  { %1743 = vmatmul.mubr.f32.gmra.mxu0 %v37_v30  ;;  %1829 = vmatmul.mubr.f32.gmra.mxu1 %v1391_v31  ;;  %v1423_v30 = vld [vmem:[%s3179_s0 + $0x258] sm:$0xff] }
  0x30   :  { %1964 = vmatpush3.msra.mxu1 %v2082_v2  ;;  %1745 = vmatprep.mubr.f32.mxu0 %v38_v32  ;;  %v55_v2 = vld [vmem:[%s3179_s0 + $0xc8] sm:$0xff]  ;;  %v1459_v31 = vld [vmem:[%s3179_s0 + $0x378] sm:$0xff]  ;;  %v1424_v32 = vld [vmem:[%s3179_s0 + $0x260] sm:$0xff] }
  0x31   :  { %1831 = vmatprep.mubr.f32.mxu1 %v1392_v33  ;;  %1880 = vmatpush3.msra.mxu0 %v2091_v3  ;;  %v1460_v33 = vld [vmem:[%s3179_s0 + $0x380] sm:$0xff] }
  0x32   :  { %1965 = vmatprep.subr.mxu1 %v2091_v3  ;;  %1881 = vmatprep.subr.mxu0 %v2100_v4 }
  0x33   :  { %1746 = vmatmul.mubr.f32.gmra.mxu0 %v39_v34  ;;  %1832 = vmatmul.mubr.f32.gmra.mxu1 %v1393_v35  ;;  %v1425_v34 = vld [vmem:[%s3179_s0 + $0x268] sm:$0xff] }
  0x34   :  { %1966 = vmatpush3.msra.mxu1 %v2091_v3  ;;  %1748 = vmatprep.mubr.f32.mxu0 %v40_v36  ;;  %v1409_v3 = vld [vmem:[%s3179_s0 + $0x1e8] sm:$0xff]  ;;  %v1426_v36 = vld [vmem:[%s3179_s0 + $0x270] sm:$0xff] }
  0x35   :  { %1834 = vmatprep.mubr.f32.mxu1 %v1394_v37  ;;  %1882 = vmatpush3.msra.mxu0 %v2100_v4  ;;  %v1461_v35 = vld [vmem:[%s3179_s0 + $0x388] sm:$0xff]  ;;  %v1462_v37 = vld [vmem:[%s3179_s0 + $0x390] sm:$0xff] }
  0x36   :  { %1967 = vmatprep.subr.mxu1 %v2100_v4  ;;  %1883 = vmatprep.subr.mxu0 %v2109_v5 }
  0x37   :  { %1749 = vmatmul.mubr.f32.gmra.mxu0 %v41_v38  ;;  %1835 = vmatmul.mubr.f32.gmra.mxu1 %v1395_v39  ;;  %v1427_v38 = vld [vmem:[%s3179_s0 + $0x278] sm:$0xff] }
  0x38   :  { %1968 = vmatpush3.msra.mxu1 %v2100_v4  ;;  %1751 = vmatprep.mubr.f32.mxu0 %v42_v40  ;;  %v56_v4 = vld [vmem:[%s3179_s0 + $0xd0] sm:$0xff]  ;;  %v1463_v39 = vld [vmem:[%s3179_s0 + $0x398] sm:$0xff]  ;;  %v1428_v40 = vld [vmem:[%s3179_s0 + $0x280] sm:$0xff] }
  0x39   :  { %1837 = vmatprep.mubr.f32.mxu1 %v1396_v41  ;;  %1884 = vmatpush3.msra.mxu0 %v2109_v5  ;;  %v1464_v41 = vld [vmem:[%s3179_s0 + $0x3a0] sm:$0xff] }
  0x3a   :  { %1969 = vmatprep.subr.mxu1 %v2109_v5  ;;  %1885 = vmatprep.subr.mxu0 %v2118_v6 }
  0x3b   :  { %1752 = vmatmul.mubr.f32.gmra.mxu0 %v43_v42  ;;  %1838 = vmatmul.mubr.f32.gmra.mxu1 %v1397_v43  ;;  %v1429_v42 = vld [vmem:[%s3179_s0 + $0x288] sm:$0xff] }
  0x3c   :  { %1970 = vmatpush3.msra.mxu1 %v2109_v5  ;;  %1754 = vmatprep.mubr.f32.mxu0 %v44_v44  ;;  %v1410_v5 = vld [vmem:[%s3179_s0 + $0x1f0] sm:$0xff]  ;;  %v1465_v43 = vld [vmem:[%s3179_s0 + $0x3a8] sm:$0xff] }
  0x3d   :  { %1840 = vmatprep.mubr.f32.mxu1 %v1398_v45  ;;  %1886 = vmatpush3.msra.mxu0 %v2118_v6  ;;  %v1430_v44 = vld [vmem:[%s3179_s0 + $0x290] sm:$0xff] }
  0x3e   :  { %1971 = vmatprep.subr.mxu1 %v2118_v6  ;;  %1887 = vmatprep.subr.mxu0 %v2127_v7  ;;  %v1466_v45 = vld [vmem:[%s3179_s0 + $0x3b0] sm:$0xff] }
  0x3f   :  { %1755 = vmatmul.mubr.f32.gmra.mxu0 %v45_v46  ;;  %1841 = vmatmul.mubr.f32.gmra.mxu1 %v1399_v47  ;;  %v1431_v46 = vld [vmem:[%s3179_s0 + $0x298] sm:$0xff] }
  0x40   :  { %1972 = vmatpush3.msra.mxu1 %v2118_v6  ;;  %1757 = vmatprep.mubr.f32.mxu0 %v46_v48  ;;  %v57_v6 = vld [vmem:[%s3179_s0 + $0xd8] sm:$0xff]  ;;  %v1432_v48 = vld [vmem:[%s3179_s0 + $0x2a0] sm:$0xff] }
  0x41   :  { %1843 = vmatprep.mubr.f32.mxu1 %v1400_v49  ;;  %1888 = vmatpush3.msra.mxu0 %v2127_v7  ;;  %v1467_v47 = vld [vmem:[%s3179_s0 + $0x3b8] sm:$0xff]  ;;  %v1468_v49 = vld [vmem:[%s3179_s0 + $0x3c0] sm:$0xff] }
  0x42   :  { %1973 = vmatprep.subr.mxu1 %v2127_v7  ;;  %1889 = vmatprep.subr.mxu0 %v2136_v8 }
  0x43   :  { %1758 = vmatmul.mubr.f32.gmra.mxu0 %v47_v50  ;;  %1844 = vmatmul.mubr.f32.gmra.mxu1 %v1401_v51  ;;  %v1433_v50 = vld [vmem:[%s3179_s0 + $0x2a8] sm:$0xff] }
  0x44   :  { %1760 = vmatprep.mubr.f32.mxu0 %v48_v52  ;;  %1846 = vmatprep.mubr.f32.mxu1 %v1402_v53  ;;  %v1469_v51 = vld [vmem:[%s3179_s0 + $0x3c8] sm:$0xff]  ;;  %v1434_v52 = vld [vmem:[%s3179_s0 + $0x2b0] sm:$0xff] }
  0x45   :  { %1974 = vmatpush3.msra.mxu1 %v2127_v7  ;;  %1890 = vmatpush3.msra.mxu0 %v2136_v8  ;;  %v1411_v7 = vld [vmem:[%s3179_s0 + $0x1f8] sm:$0xff]  ;;  %v1470_v53 = vld [vmem:[%s3179_s0 + $0x3d0] sm:$0xff] }
  0x46   :  { %1975 = vmatprep.subr.mxu1 %v2136_v8  ;;  %1891 = vmatprep.subr.mxu0 %v2145_v9 }
  0x47   :  { %1761 = vmatmul.mubr.f32.gmra.mxu0 %v49_v54  ;;  %1847 = vmatmul.mubr.f32.gmra.mxu1 %v1403_v55  ;;  %v1435_v54 = vld [vmem:[%s3179_s0 + $0x2b8] sm:$0xff] }
  0x48   :  { %1763 = vmatprep.mubr.f32.mxu0 %v50_v56  ;;  %1849 = vmatprep.mubr.f32.mxu1 %v1404_v57  ;;  %v1471_v55 = vld [vmem:[%s3179_s0 + $0x3d8] sm:$0xff]  ;;  %v1436_v56 = vld [vmem:[%s3179_s0 + $0x2c0] sm:$0xff] }
  0x49   :  { %1976 = vmatpush3.msra.mxu1 %v2136_v8  ;;  %1892 = vmatpush3.msra.mxu0 %v2145_v9  ;;  %v58_v8 = vld [vmem:[%s3179_s0 + $0xe0] sm:$0xff] }
  0x4a   :  { %1977 = vmatprep.subr.mxu1 %v2145_v9  ;;  %1893 = vmatprep.subr.mxu0 %v2154_v10  ;;  %v1472_v57 = vld [vmem:[%s3179_s0 + $0x3e0] sm:$0xff] }
  0x4b   :  { %1764 = vmatmul.mubr.f32.gmra.mxu0 %v51_v58  ;;  %1850 = vmatmul.mubr.f32.gmra.mxu1 %v1405_v59  ;;  %v1437_v58 = vld [vmem:[%s3179_s0 + $0x2c8] sm:$0xff] }
  0x4c   :  { %1766 = vmatprep.mubr.f32.mxu0 %v52_v60  ;;  %1852 = vmatprep.mubr.f32.mxu1 %v1406_v61  ;;  %v1473_v59 = vld [vmem:[%s3179_s0 + $0x3e8] sm:$0xff]  ;;  %v1438_v60 = vld [vmem:[%s3179_s0 + $0x2d0] sm:$0xff] }
  0x4d   :  { %1978 = vmatpush3.msra.mxu1 %v2145_v9  ;;  %1894 = vmatpush3.msra.mxu0 %v2154_v10  ;;  %v1412_v9 = vld [vmem:[%s3179_s0 + $0x200] sm:$0xff]  ;;  %v1474_v61 = vld [vmem:[%s3179_s0 + $0x3f0] sm:$0xff] }
  0x4e   :  { %1979 = vmatprep.subr.mxu1 %v2154_v10  ;;  %1895 = vmatprep.subr.mxu0 %v2163_v11 }
  0x4f   :  { %1767 = vmatmul.mubr.f32.gmra.mxu0 %v53_v62  ;;  %1853 = vmatmul.mubr.f32.gmra.mxu1 %v1407_v63  ;;  %v1439_v62 = vld [vmem:[%s3179_s0 + $0x2d8] sm:$0xff] }
  0x50   :  { %1769 = vmatprep.mubr.f32.mxu0 %v54_v0  ;;  %1855 = vmatprep.mubr.f32.mxu1 %v1408_v1  ;;  %v1475_v63 = vld [vmem:[%s3179_s0 + $0x3f8] sm:$0xff]  ;;  %v1440_v0 = vld [vmem:[%s3179_s0 + $0x2e0] sm:$0xff] }
  0x51   :  { %1980 = vmatpush3.msra.mxu1 %v2154_v10  ;;  %1896 = vmatpush3.msra.mxu0 %v2163_v11  ;;  %v59_v10 = vld [vmem:[%s3179_s0 + $0xe8] sm:$0xff]  ;;  %v1476_v1 = vld [vmem:[%s3179_s0 + $0x400] sm:$0xff] }
  0x52   :  { %1981 = vmatprep.subr.mxu1 %v2163_v11  ;;  %1897 = vmatprep.subr.mxu0 %v2172_v12 }
  0x53   :  { %1770 = vmatmul.mubr.f32.gmra.mxu0 %v55_v2  ;;  %1856 = vmatmul.mubr.f32.gmra.mxu1 %v1409_v3  ;;  %v1441_v2 = vld [vmem:[%s3179_s0 + $0x2e8] sm:$0xff] }
  0x54   :  { %1772 = vmatprep.mubr.f32.mxu0 %v56_v4  ;;  %1858 = vmatprep.mubr.f32.mxu1 %v1410_v5  ;;  %v1477_v3 = vld [vmem:[%s3179_s0 + $0x408] sm:$0xff]  ;;  %v1442_v4 = vld [vmem:[%s3179_s0 + $0x2f0] sm:$0xff] }
  0x55   :  { %1982 = vmatpush3.msra.mxu1 %v2163_v11  ;;  %1898 = vmatpush3.msra.mxu0 %v2172_v12  ;;  %v1413_v11 = vld [vmem:[%s3179_s0 + $0x208] sm:$0xff]  ;;  %v1478_v5 = vld [vmem:[%s3179_s0 + $0x410] sm:$0xff] }
  0x56   :  { %1983 = vmatprep.subr.mxu1 %v2172_v12  ;;  %1899 = vmatprep.subr.mxu0 %v2181_v13 }
  0x57   :  { %1773 = vmatmul.mubr.f32.gmra.mxu0 %v57_v6  ;;  %1859 = vmatmul.mubr.f32.gmra.mxu1 %v1411_v7  ;;  %v1443_v6 = vld [vmem:[%s3179_s0 + $0x2f8] sm:$0xff] }
  0x58   :  { %1775 = vmatprep.mubr.f32.mxu0 %v58_v8  ;;  %1861 = vmatprep.mubr.f32.mxu1 %v1412_v9  ;;  %v1479_v7 = vld [vmem:[%s3179_s0 + $0x418] sm:$0xff]  ;;  %v1444_v8 = vld [vmem:[%s3179_s0 + $0x300] sm:$0xff] }
  0x59   :  { %1984 = vmatpush3.msra.mxu1 %v2172_v12  ;;  %1900 = vmatpush3.msra.mxu0 %v2181_v13  ;;  %v61_v12 = vld [vmem:[%s3179_s0 + $0xf8] sm:$0xff]  ;;  %v1480_v9 = vld [vmem:[%s3179_s0 + $0x420] sm:$0xff] }
  0x5a   :  { %1985 = vmatprep.subr.mxu1 %v2181_v13  ;;  %1901 = vmatprep.subr.mxu0 %v2190_v14 }
  0x5b   :  { %1776 = vmatmul.mubr.f32.gmra.mxu0 %v59_v10  ;;  %1862 = vmatmul.mubr.f32.gmra.mxu1 %v1413_v11  ;;  %v1445_v10 = vld [vmem:[%s3179_s0 + $0x308] sm:$0xff] }
  0x5c   :  { %1778 = vmatprep.mubr.f32.mxu0 %v60_v16  ;;  %1864 = vmatprep.mubr.f32.mxu1 %v1414_v17  ;;  %v1481_v11 = vld [vmem:[%s3179_s0 + $0x428] sm:$0xff]  ;;  %v1446_v16 = vld [vmem:[%s3179_s0 + $0x310] sm:$0xff] }
  0x5d   :  { %1986 = vmatpush3.msra.mxu1 %v2181_v13  ;;  %1902 = vmatpush3.msra.mxu0 %v2190_v14  ;;  %v63_v13 = vld [vmem:[%s3179_s0 + $0x108] sm:$0xff]  ;;  %v1482_v17 = vld [vmem:[%s3179_s0 + $0x430] sm:$0xff] }
  0x5e   :  { %1987 = vmatprep.subr.mxu1 %v2190_v14  ;;  %1903 = vmatprep.subr.mxu0 %v2199_v15 }
  0x5f   :  { %1779 = vmatmul.mubr.f32.gmra.mxu0 %v61_v12  ;;  %1865 = vmatmul.mubr.f32.gmra.mxu1 %v1415_v18  ;;  %v1447_v12 = vld [vmem:[%s3179_s0 + $0x318] sm:$0xff] }
  0x60   :  { %1781 = vmatprep.mubr.f32.mxu0 %v62_v19  ;;  %1867 = vmatprep.mubr.f32.mxu1 %v1416_v20  ;;  %v1483_v18 = vld [vmem:[%s3179_s0 + $0x438] sm:$0xff]  ;;  %v1448_v19 = vld [vmem:[%s3179_s0 + $0x320] sm:$0xff] }
  0x61   :  { %1988 = vmatpush3.msra.mxu1 %v2190_v14  ;;  %1904 = vmatpush3.msra.mxu0 %v2199_v15  ;;  %v65_v14 = vld [vmem:[%s3179_s0 + $0x118] sm:$0xff]  ;;  %v1484_v20 = vld [vmem:[%s3179_s0 + $0x440] sm:$0xff] }
  0x62   :  { %1989 = vmatprep.subr.mxu1 %v2199_v15 }
  0x63   :  { %1782 = vmatmul.mubr.f32.gmra.mxu0 %v63_v13  ;;  %1868 = vmatmul.mubr.f32.gmra.mxu1 %v1417_v21  ;;  %v1449_v13 = vld [vmem:[%s3179_s0 + $0x328] sm:$0xff] }
  0x64   :  { %1784 = vmatprep.mubr.f32.mxu0 %v64_v22  ;;  %1870 = vmatprep.mubr.f32.mxu1 %v1418_v23  ;;  %v1485_v21 = vld [vmem:[%s3179_s0 + $0x448] sm:$0xff]  ;;  %v1450_v22 = vld [vmem:[%s3179_s0 + $0x330] sm:$0xff] }
  0x65   :  { %1990 = vmatpush3.msra.mxu1 %v2199_v15  ;;  %v1422_v15 = vld [vmem:[%s3179_s0 + $0x250] sm:$0xff] }
  0x66   :  { %v1486_v23 = vld [vmem:[%s3179_s0 + $0x450] sm:$0xff] }
  0x67   :  { %1785 = vmatmul.mubr.f32.gmra.mxu0 %v65_v14  ;;  %1871 = vmatmul.mubr.f32.gmra.mxu1 %v1419_v24  ;;  %v1451_v14 = vld [vmem:[%s3179_s0 + $0x338] sm:$0xff] }
  0x68   :  { %1905 = vmatprep.mubr.f32.mxu0 %v1420_v25  ;;  %1991 = vmatprep.mubr.f32.mxu1 %v1456_v26  ;;  %v1487_v24 = vld [vmem:[%s3179_s0 + $0x458] sm:$0xff]  ;;  %v1452_v25 = vld [vmem:[%s3179_s0 + $0x340] sm:$0xff] }
  0x69   :  { %v1488_v26 = vld [vmem:[%s3179_s0 + $0x460] sm:$0xff] }
  0x6b   :  { %1906 = vmatmul.mubr.f32.vlgmr.msra.gmra.mxu0 %v1421_v27  ;;  %1992 = vmatmul.mubr.f32.vlgmr.msra.gmra.mxu1 %v1457_v28  ;;  %v1453_v27 = vld [vmem:[%s3179_s0 + $0x348] sm:$0xff] }
  0x6c   :  { %1908 = vmatprep.mubr.f32.mxu0 %v1422_v15  ;;  %1994 = vmatprep.mubr.f32.mxu1 %v1458_v29  ;;  %v1489_v28 = vld [vmem:[%s3179_s0 + $0x468] sm:$0xff]  ;;  %v1454_v15 = vld [vmem:[%s3179_s0 + $0x350] sm:$0xff] }
  0x6d   :  { %v1490_v29 = vld [vmem:[%s3179_s0 + $0x470] sm:$0xff] }
  0x6f   :  { %1909 = vmatmul.mubr.f32.gmra.mxu0 %v1423_v30  ;;  %1995 = vmatmul.mubr.f32.gmra.mxu1 %v1459_v31  ;;  %v1455_v30 = vld [vmem:[%s3179_s0 + $0x358] sm:$0xff] }
  0x70   :  { %1911 = vmatprep.mubr.f32.mxu0 %v1424_v32  ;;  %1997 = vmatprep.mubr.f32.mxu1 %v1460_v33  ;;  %v1491_v31 = vld [vmem:[%s3179_s0 + $0x478] sm:$0xff] }
  0x73   :  { %1912 = vmatmul.mubr.f32.gmra.mxu0 %v1425_v34  ;;  %1998 = vmatmul.mubr.f32.gmra.mxu1 %v1461_v35 }
  0x74   :  { %1914 = vmatprep.mubr.f32.mxu0 %v1426_v36  ;;  %2000 = vmatprep.mubr.f32.mxu1 %v1462_v37 }
  0x77   :  { %1915 = vmatmul.mubr.f32.gmra.mxu0 %v1427_v38  ;;  %2001 = vmatmul.mubr.f32.gmra.mxu1 %v1463_v39 }
  0x78   :  { %1917 = vmatprep.mubr.f32.mxu0 %v1428_v40  ;;  %2003 = vmatprep.mubr.f32.mxu1 %v1464_v41 }
  0x7b   :  { %1918 = vmatmul.mubr.f32.gmra.mxu0 %v1429_v42  ;;  %2004 = vmatmul.mubr.f32.gmra.mxu1 %v1465_v43 }
  0x7c   :  { %1920 = vmatprep.mubr.f32.mxu0 %v1430_v44  ;;  %2006 = vmatprep.mubr.f32.mxu1 %v1466_v45 }
  0x7f   :  { %1921 = vmatmul.mubr.f32.gmra.mxu0 %v1431_v46  ;;  %2007 = vmatmul.mubr.f32.gmra.mxu1 %v1467_v47 }
  0x80   :  { %1923 = vmatprep.mubr.f32.mxu0 %v1432_v48  ;;  %2009 = vmatprep.mubr.f32.mxu1 %v1468_v49 }
  0x83   :  { %1924 = vmatmul.mubr.f32.gmra.mxu0 %v1433_v50  ;;  %2010 = vmatmul.mubr.f32.gmra.mxu1 %v1469_v51 }
  0x84   :  { %1926 = vmatprep.mubr.f32.mxu0 %v1434_v52  ;;  %2012 = vmatprep.mubr.f32.mxu1 %v1470_v53 }
  0x87   :  { %1927 = vmatmul.mubr.f32.gmra.mxu0 %v1435_v54  ;;  %2013 = vmatmul.mubr.f32.gmra.mxu1 %v1471_v55 }
  0x88   :  { %1929 = vmatprep.mubr.f32.mxu0 %v1436_v56  ;;  %2015 = vmatprep.mubr.f32.mxu1 %v1472_v57 }
  0x8b   :  { %1930 = vmatmul.mubr.f32.gmra.mxu0 %v1437_v58  ;;  %2016 = vmatmul.mubr.f32.gmra.mxu1 %v1473_v59 }
  0x8c   :  { %1932 = vmatprep.mubr.f32.mxu0 %v1438_v60  ;;  %2018 = vmatprep.mubr.f32.mxu1 %v1474_v61 }
  0x8f   :  { %1933 = vmatmul.mubr.f32.gmra.mxu0 %v1439_v62  ;;  %2019 = vmatmul.mubr.f32.gmra.mxu1 %v1475_v63 }
  0x90   :  { %1935 = vmatprep.mubr.f32.mxu0 %v1440_v0  ;;  %2021 = vmatprep.mubr.f32.mxu1 %v1476_v1 }
  0x93   :  { %1936 = vmatmul.mubr.f32.gmra.mxu0 %v1441_v2  ;;  %2022 = vmatmul.mubr.f32.gmra.mxu1 %v1477_v3 }
  0x94   :  { %1938 = vmatprep.mubr.f32.mxu0 %v1442_v4  ;;  %2024 = vmatprep.mubr.f32.mxu1 %v1478_v5 }
  0x97   :  { %1939 = vmatmul.mubr.f32.gmra.mxu0 %v1443_v6  ;;  %2025 = vmatmul.mubr.f32.gmra.mxu1 %v1479_v7 }
  0x98   :  { %1941 = vmatprep.mubr.f32.mxu0 %v1444_v8  ;;  %2027 = vmatprep.mubr.f32.mxu1 %v1480_v9 }
  0x9b   :  { %1942 = vmatmul.mubr.f32.gmra.mxu0 %v1445_v10  ;;  %2028 = vmatmul.mubr.f32.gmra.mxu1 %v1481_v11 }
  0x9c   :  { %1944 = vmatprep.mubr.f32.mxu0 %v1446_v16  ;;  %2030 = vmatprep.mubr.f32.mxu1 %v1482_v17 }
  0x9f   :  { %1945 = vmatmul.mubr.f32.gmra.mxu0 %v1447_v12  ;;  %2031 = vmatmul.mubr.f32.gmra.mxu1 %v1483_v18 }
  0xa0   :  { %1947 = vmatprep.mubr.f32.mxu0 %v1448_v19  ;;  %2033 = vmatprep.mubr.f32.mxu1 %v1484_v20 }
  0xa3   :  { %1948 = vmatmul.mubr.f32.gmra.mxu0 %v1449_v13  ;;  %2034 = vmatmul.mubr.f32.gmra.mxu1 %v1485_v21 }
  0xa4   :  { %1950 = vmatprep.mubr.f32.mxu0 %v1450_v22  ;;  %2036 = vmatprep.mubr.f32.mxu1 %v1486_v23 }
  0xa7   :  { %1951 = vmatmul.mubr.f32.gmra.mxu0 %v1451_v14  ;;  %2037 = vmatmul.mubr.f32.gmra.mxu1 %v1487_v24 }
  0xa8   :  { %1953 = vmatprep.mubr.f32.mxu0 %v1452_v25  ;;  %2039 = vmatprep.mubr.f32.mxu1 %v1488_v26 }
  0xab   :  { %1954 = vmatmul.mubr.f32.gmra.mxu0 %v1453_v27  ;;  %2040 = vmatmul.mubr.f32.gmra.mxu1 %v1489_v28 }
  0xac   :  { %1956 = vmatprep.mubr.f32.mxu0 %v1454_v15  ;;  %2042 = vmatprep.mubr.f32.mxu1 %v1490_v29 }
  0xaf   :  { %1957 = vmatmul.mubr.f32.gmra.mxu0 %v1455_v30  ;;  %2043 = vmatmul.mubr.f32.gmra.mxu1 %v1491_v31 }
  0xe3   :  { %v2705_v32 = vpop.f32.mrf.mxu0  ;;  %v2707_v33 = vpop.f32.mrf.mxu1 }
  0xe5   :  { %v2711_v35 = vpop.f32.mrf.mxu0  ;;  %v2713_v36 = vpop.f32.mrf.mxu1 }
  0xe7   :  { %v2717_v38 = vpop.f32.mrf.mxu0  ;;  %v2719_v39 = vpop.f32.mrf.mxu1 }
  0xe9   :  { %v2723_v41 = vpop.f32.mrf.mxu0  ;;  %v2725_v42 = vpop.f32.mrf.mxu1 }
  0xeb   :  { %v2729_v44 = vpop.f32.mrf.mxu0  ;;  %v2731_v45 = vpop.f32.mrf.mxu1 }
  0xed   :  { %v2735_v47 = vpop.f32.mrf.mxu0  ;;  %v2737_v48 = vpop.f32.mrf.mxu1 }
  0xef   :  { %v2741_v50 = vpop.f32.mrf.mxu0  ;;  %v2743_v51 = vpop.f32.mrf.mxu1 }
  0xf1   :  { %v2747_v53 = vpop.f32.mrf.mxu0  ;;  %v2749_v54 = vpop.f32.mrf.mxu1 }
  0xf3   :  { %v2753_v56 = vpop.f32.mrf.mxu0  ;;  %v2755_v57 = vpop.f32.mrf.mxu1 }
  0xf5   :  { %v2759_v59 = vpop.f32.mrf.mxu0  ;;  %v2761_v60 = vpop.f32.mrf.mxu1 }
  0xf7   :  { %v2765_v62 = vpop.f32.mrf.mxu0  ;;  %v2767_v63 = vpop.f32.mrf.mxu1 }
  0xf9   :  { %v2771_v1 = vpop.f32.mrf.mxu0  ;;  %v2773_v2 = vpop.f32.mrf.mxu1 }
  0xfb   :  { %v2777_v4 = vpop.f32.mrf.mxu0  ;;  %v2779_v5 = vpop.f32.mrf.mxu1 }
  0xfd   :  { %v2783_v7 = vpop.f32.mrf.mxu0  ;;  %v2785_v8 = vpop.f32.mrf.mxu1 }
  0xff   :  { %v2789_v10 = vpop.f32.mrf.mxu0  ;;  %v2791_v11 = vpop.f32.mrf.mxu1 }
 0x101   :  { %v2795_v17 = vpop.f32.mrf.mxu0  ;;  %v2797_v12 = vpop.f32.mrf.mxu1 }
 0x103   :  { %v2801_v19 = vpop.f32.mrf.mxu0  ;;  %v2803_v20 = vpop.f32.mrf.mxu1 }
 0x105   :  { %v2807_v21 = vpop.f32.mrf.mxu0  ;;  %v2809_v22 = vpop.f32.mrf.mxu1 }
 0x107   :  { %v2813_v14 = vpop.f32.mrf.mxu0  ;;  %v2815_v24 = vpop.f32.mrf.mxu1 }
 0x109   :  { %v2819_v26 = vpop.f32.mrf.mxu0  ;;  %v2821_v27 = vpop.f32.mrf.mxu1 }
 0x10b   :  { %v2825_v15 = vpop.f32.mrf.mxu0  ;;  %v2827_v29 = vpop.f32.mrf.mxu1 }
 0x10d   :  { %v2831_v31 = vpop.f32.mrf.mxu0  ;;  %v2833_v23 = vpop.f32.mrf.mxu1 }
 0x10f   :  { %v2837_v13 = vpop.f32.mrf.mxu0  ;;  %v2839_v18 = vpop.f32.mrf.mxu1 }
 0x111   :  { %v2843_v16 = vpop.f32.mrf.mxu0  ;;  %v2845_v9 = vpop.f32.mrf.mxu1 }
 0x112   :  { %3207 = vst [vmem:[#allocation2_spill] sm:$0xff] %v2845_v9 }
 0x113   :  { %v2849_v6 = vpop.f32.mrf.mxu0  ;;  %v2851_v3 = vpop.f32.mrf.mxu1 }
 0x114   :  { %3208 = vst [vmem:[#allocation3_spill] sm:$0xff] %v2849_v6  ;;  %3209 = vst [vmem:[#allocation4_spill] sm:$0xff] %v2851_v3 }
 0x115   :  { %v2855_v0 = vpop.f32.mrf.mxu0  ;;  %v2857_v61 = vpop.f32.mrf.mxu1 }
 0x116   :  { %3210 = vst [vmem:[#allocation5_spill] sm:$0xff] %v2855_v0  ;;  %3211 = vst [vmem:[#allocation6_spill] sm:$0xff] %v2857_v61 }
 0x117   :  { %v2861_v58 = vpop.f32.mrf.mxu0  ;;  %v2863_v55 = vpop.f32.mrf.mxu1 }
 0x118   :  { %3212 = vst [vmem:[#allocation7_spill] sm:$0xff] %v2861_v58  ;;  %3213 = vst [vmem:[#allocation8_spill] sm:$0xff] %v2863_v55  ;;  %v3232_v58 = vmax.f32 %v2705_v32, %v2707_v33  ;;  %v3234_v32 = vmax.f32 %v2717_v38, %v2719_v39 }
 0x119   :  { %v2867_v52 = vpop.f32.mrf.mxu0  ;;  %v2869_v49 = vpop.f32.mrf.mxu1 }
 0x11a   :  { %3214 = vst [vmem:[#allocation9_spill] sm:$0xff] %v2867_v52  ;;  %3215 = vst [vmem:[#allocation10_spill] sm:$0xff] %v2869_v49 }
 0x11b   :  { %v2873_v46 = vpop.f32.mrf.mxu0  ;;  %v2875_v43 = vpop.f32.mrf.mxu1 }
 0x11c   :  { %3216 = vst [vmem:[#allocation11_spill] sm:$0xff] %v2873_v46  ;;  %3217 = vst [vmem:[#allocation12_spill] sm:$0xff] %v2875_v43 }
 0x11d   :  { %v2879_v40 = vpop.f32.mrf.mxu0  ;;  %v2881_v37 = vpop.f32.mrf.mxu1 }
 0x11e   :  { %3218 = vst [vmem:[#allocation13_spill] sm:$0xff] %v2879_v40  ;;  %3219 = vst [vmem:[#allocation14_spill] sm:$0xff] %v2881_v37 }
 0x11f   :  { %v2885_v34 = vpop.f32.mrf.mxu0  ;;  %v2887_v55 = vpop.f32.mrf.mxu1 }
 0x120   :  { %3220 = vst [vmem:[#allocation15_spill] sm:$0xff] %v2885_v34  ;;  %3221 = vst [vmem:[#allocation16_spill] sm:$0xff] %v2887_v55 }
 0x121   :  { %v2891_v49 = vpop.f32.mrf.mxu0  ;;  %v2893_v52 = vpop.f32.mrf.mxu1 }
 0x122   :  { %3222 = vst [vmem:[#allocation17_spill] sm:$0xff] %v2891_v49  ;;  %3223 = vst [vmem:[#allocation18_spill] sm:$0xff] %v2893_v52 }
 0x123   :  { %v2897_v43 = vpop.f32.mrf.mxu0  ;;  %v2899_v46 = vpop.f32.mrf.mxu1 }
 0x124   :  { %3224 = vst [vmem:[#allocation19_spill] sm:$0xff] %v2897_v43  ;;  %3225 = vst [vmem:[#allocation20_spill] sm:$0xff] %v2899_v46 }
 0x125   :  { %v2903_v37 = vpop.f32.mrf.mxu0  ;;  %v2905_v40 = vpop.f32.mrf.mxu1 }
 0x126   :  { %3226 = vst [vmem:[#allocation21_spill] sm:$0xff] %v2903_v37  ;;  %3227 = vst [vmem:[#allocation22_spill] sm:$0xff] %v2905_v40  ;;  %v2927_v40 = vld [vmem:[%s3180_s2] ss:$0 sm:$0xff] }
 0x127   :  { %v2909_v55 = vpop.f32.mrf.mxu0  ;;  %v2911_v34 = vpop.f32.mrf.mxu1 }
 0x128   :  { %3228 = vst [vmem:[#allocation23_spill] sm:$0xff] %v2909_v55  ;;  %3229 = vst [vmem:[#allocation24_spill] sm:$0xff] %v2911_v34  ;;  %v3233_v55 = vmax.f32 %v2711_v35, %v2713_v36 }
 0x129   :  { %v2915_v52 = vpop.f32.mrf.mxu0  ;;  %v2917_v49 = vpop.f32.mrf.mxu1 }
 0x12a   :  { %3230 = vst [vmem:[#allocation25_spill] sm:$0xff] %v2915_v52  ;;  %3231 = vst [vmem:[#allocation26_spill] sm:$0xff] %v2917_v49 }
 0x12b   :  { %v1907_v46 = vpop.f32.mrf.mxu0  ;;  %v1993_v43 = vpop.f32.mrf.mxu1 }
 0x12c   :  { %v912_v25 = vmax.f32 %v3232_v58, %v1907_v46 }
 0x12d   :  { %v732_v37 = vpop.f32.mrf.mxu0  ;;  %v1050_v28 = vpop.f32.mrf.mxu1 }
 0x12e   :  { %v1230_v34 = vmax.f32 %v912_v25, %v1993_v43  ;;  %v911_v61 = vmax.f32 %v3233_v55, %v732_v37  ;;  %v3235_v43 = vmax.f32 %v2723_v41, %v2725_v42 }
 0x12f   :  { %v1910_v0 = vpop.f32.mrf.mxu0  ;;  %v1996_v30 = vpop.f32.mrf.mxu1 }
 0x130   :  { %v1273_v49 = vadd.f32 %v2927_v40, %v1230_v34  ;;  %v1229_v52 = vmax.f32 %v911_v61, %v1050_v28  ;;  %v914_v33 = vmax.f32 %v3234_v32, %v1910_v0 }
 0x131   :  { %v742_v46 = vpop.f32.mrf.mxu0  ;;  %v1060_v58 = vpop.f32.mrf.mxu1 }
 0x132   :  { %v1309_v3 = vmax.f32 %v1273_v49, 0.0  ;;  %v1272_v6 = vadd.f32 %v2927_v40, %v1229_v52  ;;  %v1232_v9 = vmax.f32 %v914_v33, %v1996_v30  ;;  %v913_v35 = vmax.f32 %v3235_v43, %v742_v46 }
 0x133   :  { %v1913_v36 = vpop.f32.mrf.mxu0  ;;  %v1999_v37 = vpop.f32.mrf.mxu1  ;;  %v3236_v49 = vmax.f32 %v2729_v44, %v2731_v45  ;;  %v3238_v30 = vmax.f32 %v2741_v50, %v2743_v51  ;;  %v3239_v43 = vmax.f32 %v2747_v53, %v2749_v54 }
 0x134   :  { %1345 = vst [vmem:[%s3181_s3 + $0x8] sm:$0xff] %v1309_v3  ;;  %v1308_v34 = vmax.f32 %v1272_v6, 0.0  ;;  %v1275_v38 = vadd.f32 %v2927_v40, %v1232_v9  ;;  %v1231_v39 = vmax.f32 %v913_v35, %v1060_v58  ;;  %v3237_v3 = vmax.f32 %v2735_v47, %v2737_v48 }
 0x135   :  { %v916_v55 = vmax.f32 %v3236_v49, %v1913_v36  ;;  %v752_v52 = vpop.f32.mrf.mxu0  ;;  %v1070_v61 = vpop.f32.mrf.mxu1 }
 0x136   :  { %1344 = vst [vmem:[%s3181_s3] sm:$0xff] %v1308_v34  ;;  %v1311_v41 = vmax.f32 %v1275_v38, 0.0  ;;  %v1274_v42 = vadd.f32 %v2927_v40, %v1231_v39  ;;  %v915_v6 = vmax.f32 %v3237_v3, %v752_v52  ;;  %v3240_v38 = vmax.f32 %v2753_v56, %v2755_v57 }
 0x137   :  { %v1234_v0 = vmax.f32 %v916_v55, %v1999_v37  ;;  %v1916_v9 = vpop.f32.mrf.mxu0  ;;  %v2002_v25 = vpop.f32.mrf.mxu1 }
 0x138   :  { %1347 = vst [vmem:[%s3181_s3 + $0x18] sm:$0xff] %v1311_v41  ;;  %v1310_v44 = vmax.f32 %v1274_v42, 0.0  ;;  %v1233_v28 = vmax.f32 %v915_v6, %v1070_v61  ;;  %v918_v32 = vmax.f32 %v3238_v30, %v1916_v9  ;;  %v3241_v61 = vmax.f32 %v2759_v59, %v2761_v60 }
 0x139   :  { %v1277_v45 = vadd.f32 %v2927_v40, %v1234_v0  ;;  %v762_v33 = vpop.f32.mrf.mxu0  ;;  %v1080_v46 = vpop.f32.mrf.mxu1  ;;  %v3242_v6 = vmax.f32 %v2765_v62, %v2767_v63 }
 0x13a   :  { %1346 = vst [vmem:[%s3181_s3 + $0x10] sm:$0xff] %v1310_v44  ;;  %v1276_v48 = vadd.f32 %v2927_v40, %v1233_v28  ;;  %v1236_v58 = vmax.f32 %v918_v32, %v2002_v25  ;;  %v917_v35 = vmax.f32 %v3239_v43, %v762_v33  ;;  %v3243_v28 = vmax.f32 %v2771_v1, %v2773_v2 }
 0x13b   :  { %v1313_v47 = vmax.f32 %v1277_v45, 0.0  ;;  %v1919_v36 = vpop.f32.mrf.mxu0  ;;  %v2005_v37 = vpop.f32.mrf.mxu1 }
 0x13c   :  { %v1312_v50 = vmax.f32 %v1276_v48, 0.0  ;;  %v1279_v51 = vadd.f32 %v2927_v40, %v1236_v58  ;;  %v1235_v34 = vmax.f32 %v917_v35, %v1080_v46  ;;  %v920_v39 = vmax.f32 %v3240_v38, %v1919_v36 }
 0x13d   :  { %1349 = vst [vmem:[%s3181_s3 + $0x28] sm:$0xff] %v1313_v47  ;;  %v772_v49 = vpop.f32.mrf.mxu0  ;;  %v1090_v55 = vpop.f32.mrf.mxu1  ;;  %v3244_v47 = vmax.f32 %v2777_v4, %v2779_v5  ;;  %v3245_v36 = vmax.f32 %v2783_v7, %v2785_v8  ;;  %v3246_v38 = vmax.f32 %v2789_v10, %v2791_v11 }
 0x13e   :  { %1348 = vst [vmem:[%s3181_s3 + $0x20] sm:$0xff] %v1312_v50  ;;  %v1315_v53 = vmax.f32 %v1279_v51, 0.0  ;;  %v1278_v54 = vadd.f32 %v2927_v40, %v1235_v34  ;;  %v1238_v52 = vmax.f32 %v920_v39, %v2005_v37  ;;  %v919_v41 = vmax.f32 %v3241_v61, %v772_v49 }
 0x13f   :  { %v1922_v42 = vpop.f32.mrf.mxu0  ;;  %v2008_v0 = vpop.f32.mrf.mxu1 }
 0x140   :  { %1351 = vst [vmem:[%s3181_s3 + $0x38] sm:$0xff] %v1315_v53  ;;  %v1314_v56 = vmax.f32 %v1278_v54, 0.0  ;;  %v1281_v57 = vadd.f32 %v2927_v40, %v1238_v52  ;;  %v1237_v3 = vmax.f32 %v919_v41, %v1090_v55  ;;  %v922_v9 = vmax.f32 %v3242_v6, %v1922_v42 }
 0x141   :  { %v782_v25 = vpop.f32.mrf.mxu0  ;;  %v1100_v44 = vpop.f32.mrf.mxu1  ;;  %v3247_v54 = vmax.f32 %v2795_v17, %v2797_v12 }
 0x142   :  { %1350 = vst [vmem:[%s3181_s3 + $0x30] sm:$0xff] %v1314_v56  ;;  %v1317_v59 = vmax.f32 %v1281_v57, 0.0  ;;  %v1280_v60 = vadd.f32 %v2927_v40, %v1237_v3  ;;  %v1240_v45 = vmax.f32 %v922_v9, %v2008_v0  ;;  %v921_v30 = vmax.f32 %v3243_v28, %v782_v25 }
 0x143   :  { %v1925_v32 = vpop.f32.mrf.mxu0  ;;  %v2011_v33 = vpop.f32.mrf.mxu1  ;;  %v3248_v0 = vmax.f32 %v2801_v19, %v2803_v20  ;;  %v3249_v9 = vmax.f32 %v2807_v21, %v2809_v22 }
 0x144   :  { %1353 = vst [vmem:[%s3181_s3 + $0x48] sm:$0xff] %v1317_v59  ;;  %v1316_v62 = vmax.f32 %v1280_v60, 0.0  ;;  %v1283_v63 = vadd.f32 %v2927_v40, %v1240_v45  ;;  %v1239_v46 = vmax.f32 %v921_v30, %v1100_v44  ;;  %v924_v48 = vmax.f32 %v3244_v47, %v1925_v32 }
 0x145   :  { %v792_v58 = vpop.f32.mrf.mxu0  ;;  %v1110_v43 = vpop.f32.mrf.mxu1  ;;  %v3250_v45 = vmax.f32 %v2813_v14, %v2815_v24 }
 0x146   :  { %1352 = vst [vmem:[%s3181_s3 + $0x40] sm:$0xff] %v1316_v62  ;;  %v1319_v1 = vmax.f32 %v1283_v63, 0.0  ;;  %v1282_v2 = vadd.f32 %v2927_v40, %v1239_v46  ;;  %v1242_v35 = vmax.f32 %v924_v48, %v2011_v33  ;;  %v923_v37 = vmax.f32 %v3245_v36, %v792_v58 }
 0x147   :  { %v1928_v50 = vpop.f32.mrf.mxu0  ;;  %v2014_v51 = vpop.f32.mrf.mxu1  ;;  %v3251_v62 = vmax.f32 %v2819_v26, %v2821_v27  ;;  %v3252_v58 = vmax.f32 %v2825_v15, %v2827_v29  ;;  %v3253_v36 = vmax.f32 %v2831_v31, %v2833_v23 }
 0x148   :  { %1355 = vst [vmem:[%s3181_s3 + $0x58] sm:$0xff] %v1319_v1  ;;  %v1318_v4 = vmax.f32 %v1282_v2, 0.0  ;;  %v1285_v5 = vadd.f32 %v2927_v40, %v1242_v35  ;;  %v1241_v34 = vmax.f32 %v923_v37, %v1110_v43  ;;  %v926_v39 = vmax.f32 %v3246_v38, %v1928_v50 }
 0x149   :  { %v802_v49 = vpop.f32.mrf.mxu0  ;;  %v1120_v55 = vpop.f32.mrf.mxu1 }
 0x14a   :  { %1354 = vst [vmem:[%s3181_s3 + $0x50] sm:$0xff] %v1318_v4  ;;  %v1321_v7 = vmax.f32 %v1285_v5, 0.0  ;;  %v1284_v8 = vadd.f32 %v2927_v40, %v1241_v34  ;;  %v1244_v53 = vmax.f32 %v926_v39, %v2014_v51  ;;  %v925_v52 = vmax.f32 %v3247_v54, %v802_v49 }
 0x14b   :  { %v1931_v61 = vpop.f32.mrf.mxu0  ;;  %v2017_v41 = vpop.f32.mrf.mxu1  ;;  %v3254_v5 = vmax.f32 %v2837_v13, %v2839_v18 }
 0x14c   :  { %1357 = vst [vmem:[%s3181_s3 + $0x68] sm:$0xff] %v1321_v7  ;;  %v1320_v10 = vmax.f32 %v1284_v8, 0.0  ;;  %v1287_v11 = vadd.f32 %v2927_v40, %v1244_v53  ;;  %v1243_v42 = vmax.f32 %v925_v52, %v1120_v55  ;;  %v928_v56 = vmax.f32 %v3248_v0, %v1931_v61  ;;  %v3255_v55 = vld [vmem:[#allocation2_spill] sm:$0xff]  ;;  %v3257_v61 = vld [vmem:[#allocation3_spill] sm:$0xff] }
 0x14d   :  { %v812_v57 = vpop.f32.mrf.mxu0  ;;  %v1130_v3 = vpop.f32.mrf.mxu1  ;;  %v3256_v7 = vmax.f32 %v2843_v16, %v3255_v55  ;;  %v3276_v55 = vld [vmem:[#allocation16_spill] sm:$0xff] }
 0x14e   :  { %1356 = vst [vmem:[%s3181_s3 + $0x60] sm:$0xff] %v1320_v10  ;;  %v1323_v17 = vmax.f32 %v1287_v11, 0.0  ;;  %v1286_v12 = vadd.f32 %v2927_v40, %v1243_v42  ;;  %v1246_v6 = vmax.f32 %v928_v56, %v2017_v41  ;;  %v927_v25 = vmax.f32 %v3249_v9, %v812_v57  ;;  %v3258_v41 = vld [vmem:[#allocation4_spill] sm:$0xff] }
 0x14f   :  { %v1934_v44 = vpop.f32.mrf.mxu0  ;;  %v2020_v59 = vpop.f32.mrf.mxu1  ;;  %v3259_v10 = vmax.f32 %v3257_v61, %v3258_v41  ;;  %v3278_v61 = vld [vmem:[#allocation17_spill] sm:$0xff]  ;;  %v3279_v41 = vld [vmem:[#allocation18_spill] sm:$0xff] }
 0x150   :  { %1359 = vst [vmem:[%s3181_s3 + $0x78] sm:$0xff] %v1323_v17  ;;  %v1322_v19 = vmax.f32 %v1286_v12, 0.0  ;;  %v1289_v20 = vadd.f32 %v2927_v40, %v1246_v6  ;;  %v1245_v60 = vmax.f32 %v927_v25, %v1130_v3  ;;  %v930_v28 = vmax.f32 %v3250_v45, %v1934_v44  ;;  %v3260_v3 = vld [vmem:[#allocation5_spill] sm:$0xff]  ;;  %v3261_v17 = vld [vmem:[#allocation6_spill] sm:$0xff] }
 0x151   :  { %v822_v30 = vpop.f32.mrf.mxu0  ;;  %v1140_v32 = vpop.f32.mrf.mxu1  ;;  %v3262_v12 = vmax.f32 %v3260_v3, %v3261_v17  ;;  %v3281_v3 = vld [vmem:[#allocation19_spill] sm:$0xff]  ;;  %v3282_v17 = vld [vmem:[#allocation20_spill] sm:$0xff] }
 0x152   :  { %1358 = vst [vmem:[%s3181_s3 + $0x70] sm:$0xff] %v1322_v19  ;;  %v1325_v21 = vmax.f32 %v1289_v20, 0.0  ;;  %v1288_v22 = vadd.f32 %v2927_v40, %v1245_v60  ;;  %v1248_v33 = vmax.f32 %v930_v28, %v2020_v59  ;;  %v929_v63 = vmax.f32 %v3251_v62, %v822_v30  ;;  %v3263_v20 = vld [vmem:[#allocation7_spill] sm:$0xff]  ;;  %v3264_v60 = vld [vmem:[#allocation8_spill] sm:$0xff]  ;;  %v3266_v62 = vld [vmem:[#allocation9_spill] sm:$0xff] }
 0x153   :  { %v1937_v46 = vpop.f32.mrf.mxu0  ;;  %v2023_v47 = vpop.f32.mrf.mxu1  ;;  %v3265_v45 = vmax.f32 %v3263_v20, %v3264_v60  ;;  %v3284_v20 = vld [vmem:[#allocation21_spill] sm:$0xff]  ;;  %v3285_v60 = vld [vmem:[#allocation22_spill] sm:$0xff] }
 0x154   :  { %1361 = vst [vmem:[%s3181_s3 + $0x88] sm:$0xff] %v1325_v21  ;;  %v1324_v14 = vmax.f32 %v1288_v22, 0.0  ;;  %v1291_v24 = vadd.f32 %v2927_v40, %v1248_v33  ;;  %v1247_v48 = vmax.f32 %v929_v63, %v1140_v32  ;;  %v932_v43 = vmax.f32 %v3252_v58, %v1937_v46  ;;  %v3267_v63 = vld [vmem:[#allocation10_spill] sm:$0xff] }
 0x155   :  { %v832_v1 = vpop.f32.mrf.mxu0  ;;  %v1150_v2 = vpop.f32.mrf.mxu1  ;;  %v3268_v46 = vmax.f32 %v3266_v62, %v3267_v63  ;;  %v3287_v62 = vld [vmem:[#allocation23_spill] sm:$0xff]  ;;  %v3288_v63 = vld [vmem:[#allocation24_spill] sm:$0xff] }
 0x156   :  { %1360 = vst [vmem:[%s3181_s3 + $0x80] sm:$0xff] %v1324_v14  ;;  %v1327_v26 = vmax.f32 %v1291_v24, 0.0  ;;  %v1290_v27 = vadd.f32 %v2927_v40, %v1247_v48  ;;  %v1250_v35 = vmax.f32 %v932_v43, %v2023_v47  ;;  %v931_v37 = vmax.f32 %v3253_v36, %v832_v1  ;;  %v3269_v1 = vld [vmem:[#allocation11_spill] sm:$0xff] }
 0x157   :  { %v1940_v50 = vpop.f32.mrf.mxu0  ;;  %v2026_v51 = vpop.f32.mrf.mxu1 }
 0x158   :  { %1363 = vst [vmem:[%s3181_s3 + $0x98] sm:$0xff] %v1327_v26  ;;  %v1326_v15 = vmax.f32 %v1290_v27, 0.0  ;;  %v1293_v29 = vadd.f32 %v2927_v40, %v1250_v35  ;;  %v1249_v4 = vmax.f32 %v931_v37, %v1150_v2  ;;  %v934_v34 = vmax.f32 %v3254_v5, %v1940_v50  ;;  %v3270_v2 = vld [vmem:[#allocation12_spill] sm:$0xff] }
 0x159   :  { %v842_v38 = vpop.f32.mrf.mxu0  ;;  %v1160_v39 = vpop.f32.mrf.mxu1  ;;  %v3271_v26 = vmax.f32 %v3269_v1, %v3270_v2  ;;  %v3291_v1 = vld [vmem:[#allocation26_spill] sm:$0xff] }
 0x15a   :  { %1362 = vst [vmem:[%s3181_s3 + $0x90] sm:$0xff] %v1326_v15  ;;  %v1329_v23 = vmax.f32 %v1293_v29, 0.0  ;;  %v1292_v31 = vadd.f32 %v2927_v40, %v1249_v4  ;;  %v1252_v49 = vmax.f32 %v934_v34, %v2026_v51  ;;  %v933_v8 = vmax.f32 %v3256_v7, %v842_v38  ;;  %v3272_v15 = vld [vmem:[#allocation13_spill] sm:$0xff]  ;;  %v3273_v29 = vld [vmem:[#allocation14_spill] sm:$0xff] }
 0x15b   :  { %v1943_v53 = vpop.f32.mrf.mxu0  ;;  %v2029_v54 = vpop.f32.mrf.mxu1  ;;  %v3274_v4 = vmax.f32 %v3272_v15, %v3273_v29 }
 0x15c   :  { %1365 = vst [vmem:[%s3181_s3 + $0xa8] sm:$0xff] %v1329_v23  ;;  %v1328_v18 = vmax.f32 %v1292_v31, 0.0  ;;  %v1295_v13 = vadd.f32 %v2927_v40, %v1252_v49  ;;  %v1251_v52 = vmax.f32 %v933_v8, %v1160_v39  ;;  %v936_v11 = vmax.f32 %v3259_v10, %v1943_v53  ;;  %v3275_v49 = vld [vmem:[#allocation15_spill] sm:$0xff] }
 0x15d   :  { %v852_v42 = vpop.f32.mrf.mxu0  ;;  %v1170_v0 = vpop.f32.mrf.mxu1  ;;  %v3277_v7 = vmax.f32 %v3275_v49, %v3276_v55  ;;  %v3280_v10 = vmax.f32 %v3278_v61, %v3279_v41 }
 0x15e   :  { %1364 = vst [vmem:[%s3181_s3 + $0xa0] sm:$0xff] %v1328_v18  ;;  %v1331_v16 = vmax.f32 %v1295_v13, 0.0  ;;  %v1294_v56 = vadd.f32 %v2927_v40, %v1251_v52  ;;  %v1254_v57 = vmax.f32 %v936_v11, %v2029_v54  ;;  %v935_v6 = vmax.f32 %v3262_v12, %v852_v42 }
 0x15f   :  { %v1946_v9 = vpop.f32.mrf.mxu0  ;;  %v2032_v25 = vpop.f32.mrf.mxu1  ;;  %v3283_v12 = vmax.f32 %v3281_v3, %v3282_v17 }
 0x160   :  { %1367 = vst [vmem:[%s3181_s3 + $0xb8] sm:$0xff] %v1331_v16  ;;  %v1330_v44 = vmax.f32 %v1294_v56, 0.0  ;;  %v1297_v59 = vadd.f32 %v2927_v40, %v1254_v57  ;;  %v1253_v19 = vmax.f32 %v935_v6, %v1170_v0  ;;  %v938_v28 = vmax.f32 %v3265_v45, %v1946_v9 }
 0x161   :  { %v862_v30 = vpop.f32.mrf.mxu0  ;;  %v1180_v32 = vpop.f32.mrf.mxu1  ;;  %v3286_v45 = vmax.f32 %v3284_v20, %v3285_v60 }
 0x162   :  { %1366 = vst [vmem:[%s3181_s3 + $0xb0] sm:$0xff] %v1330_v44  ;;  %v1333_v21 = vmax.f32 %v1297_v59, 0.0  ;;  %v1296_v22 = vadd.f32 %v2927_v40, %v1253_v19  ;;  %v1256_v33 = vmax.f32 %v938_v28, %v2032_v25  ;;  %v937_v47 = vmax.f32 %v3268_v46, %v862_v30 }
 0x163   :  { %v1949_v14 = vpop.f32.mrf.mxu0  ;;  %v2035_v24 = vpop.f32.mrf.mxu1  ;;  %v3289_v46 = vmax.f32 %v3287_v62, %v3288_v63 }
 0x164   :  { %1369 = vst [vmem:[%s3181_s3 + $0xc8] sm:$0xff] %v1333_v21  ;;  %v1332_v48 = vmax.f32 %v1296_v22, 0.0  ;;  %v1299_v58 = vadd.f32 %v2927_v40, %v1256_v33  ;;  %v1255_v43 = vmax.f32 %v937_v47, %v1180_v32  ;;  %v940_v27 = vmax.f32 %v3271_v26, %v1949_v14 }
 0x165   :  { %v872_v35 = vpop.f32.mrf.mxu0  ;;  %v1190_v36 = vpop.f32.mrf.mxu1 }
 0x166   :  { %1368 = vst [vmem:[%s3181_s3 + $0xc0] sm:$0xff] %v1332_v48  ;;  %v1335_v37 = vmax.f32 %v1299_v58, 0.0  ;;  %v1298_v50 = vadd.f32 %v2927_v40, %v1255_v43  ;;  %v1258_v51 = vmax.f32 %v940_v27, %v2035_v24  ;;  %v939_v5 = vmax.f32 %v3274_v4, %v872_v35  ;;  %v3290_v43 = vld [vmem:[#allocation25_spill] sm:$0xff] }
 0x167   :  { %v1952_v34 = vpop.f32.mrf.mxu0  ;;  %v2038_v38 = vpop.f32.mrf.mxu1  ;;  %v3292_v2 = vmax.f32 %v3290_v43, %v3291_v1 }
 0x168   :  { %1371 = vst [vmem:[%s3181_s3 + $0xd8] sm:$0xff] %v1335_v37  ;;  %v1334_v39 = vmax.f32 %v1298_v50, 0.0  ;;  %v1301_v23 = vadd.f32 %v2927_v40, %v1258_v51  ;;  %v1257_v31 = vmax.f32 %v939_v5, %v1190_v36  ;;  %v942_v8 = vmax.f32 %v3277_v7, %v1952_v34 }
 0x169   :  { %v882_v53 = vpop.f32.mrf.mxu0  ;;  %v1200_v54 = vpop.f32.mrf.mxu1 }
 0x16a   :  { %1370 = vst [vmem:[%s3181_s3 + $0xd0] sm:$0xff] %v1334_v39  ;;  %v1337_v18 = vmax.f32 %v1301_v23, 0.0  ;;  %v1300_v13 = vadd.f32 %v2927_v40, %v1257_v31  ;;  %v1260_v52 = vmax.f32 %v942_v8, %v2038_v38  ;;  %v941_v11 = vmax.f32 %v3280_v10, %v882_v53 }
 0x16b   :  { %v1955_v42 = vpop.f32.mrf.mxu0  ;;  %v2041_v0 = vpop.f32.mrf.mxu1 }
 0x16c   :  { %1373 = vst [vmem:[%s3181_s3 + $0xe8] sm:$0xff] %v1337_v18  ;;  %v1336_v16 = vmax.f32 %v1300_v13, 0.0  ;;  %v1303_v56 = vadd.f32 %v2927_v40, %v1260_v52  ;;  %v1259_v57 = vmax.f32 %v941_v11, %v1200_v54  ;;  %v944_v6 = vmax.f32 %v3283_v12, %v1955_v42 }
 0x16d   :  { %v892_v9 = vpop.f32.mrf.mxu0  ;;  %v1210_v25 = vpop.f32.mrf.mxu1 }
 0x16e   :  { %1372 = vst [vmem:[%s3181_s3 + $0xe0] sm:$0xff] %v1336_v16  ;;  %v1339_v44 = vmax.f32 %v1303_v56, 0.0  ;;  %v1302_v59 = vadd.f32 %v2927_v40, %v1259_v57  ;;  %v1262_v19 = vmax.f32 %v944_v6, %v2041_v0  ;;  %v943_v28 = vmax.f32 %v3286_v45, %v892_v9 }
 0x16f   :  { %v1958_v30 = vpop.f32.mrf.mxu0  ;;  %v2044_v32 = vpop.f32.mrf.mxu1 }
 0x170   :  { %1375 = vst [vmem:[%s3181_s3 + $0xf8] sm:$0xff] %v1339_v44  ;;  %v1338_v21 = vmax.f32 %v1302_v59, 0.0  ;;  %v1305_v22 = vadd.f32 %v2927_v40, %v1262_v19  ;;  %v1261_v33 = vmax.f32 %v943_v28, %v1210_v25  ;;  %v946_v47 = vmax.f32 %v3289_v46, %v1958_v30 }
 0x171   :  { %v902_v14 = vpop.f32.mrf.mxu0  ;;  %v1220_v27 = vpop.f32.mrf.mxu1 }
 0x172   :  { %1374 = vst [vmem:[%s3181_s3 + $0xf0] sm:$0xff] %v1338_v21  ;;  %v1341_v24 = vmax.f32 %v1305_v22, 0.0  ;;  %v1304_v48 = vadd.f32 %v2927_v40, %v1261_v33  ;;  %v1264_v58 = vmax.f32 %v946_v47, %v2044_v32  ;;  %v945_v26 = vmax.f32 %v3292_v2, %v902_v14 }
 0x174   :  { %1377 = vst [vmem:[%s3181_s3 + $0x108] sm:$0xff] %v1341_v24  ;;  %v1340_v35 = vmax.f32 %v1304_v48, 0.0  ;;  %v1307_v36 = vadd.f32 %v2927_v40, %v1264_v58  ;;  %v1263_v37 = vmax.f32 %v945_v26, %v1220_v27 }
 0x176   :  { %1376 = vst [vmem:[%s3181_s3 + $0x100] sm:$0xff] %v1340_v35  ;;  %v1343_v50 = vmax.f32 %v1307_v36, 0.0  ;;  %v1306_v51 = vadd.f32 %v2927_v40, %v1263_v37 }
 0x178   :  { %1379 = vst [vmem:[%s3181_s3 + $0x118] sm:$0xff] %v1343_v50  ;;  %v1342_v15 = vmax.f32 %v1306_v51, 0.0 }
 0x17a   :  { %1378 = vst [vmem:[%s3181_s3 + $0x110] sm:$0xff] %v1342_v15 }

// kernel: lenet_forward.4
= control target key start
LH: loop header
LB: loop body
LE: loop exit
PB: predicated region body
PF: predicated region fallthrough
CT: control target
= control target key end

     0   :  { %s1076_s1 = inlined_call_operand.vmem [shape: f32[256,128], index: 1, kind: input, shape index: {}]   ;;  %s1077_s0 = inlined_call_operand.vmem [shape: f32[4,32,256], index: 0, kind: input, shape index: {}]   ;;  %s1078_s2 = inlined_call_operand.vmem [shape: f32[1,128], index: 2, kind: input, shape index: {}]   ;;  %s1079_s3 = inlined_call_operand.vmem [shape: f32[32,128], index: 3, kind: output, shape index: {}]  }
   0x1   :  { %v680_v0 = vld [vmem:[%s1076_s1 + $0xf8] sm:$0xff]  ;;  %v690_v2 = vld [vmem:[%s1076_s1 + $0xf0] sm:$0xff]  ;;  %v704_v4 = vld [vmem:[%s1076_s1 + $0xe8] sm:$0xff] }
   0x2   :  { %v685_v1 = vld [vmem:[%s1076_s1 + $0x78] sm:$0xff]  ;;  %481 = vmatprep.subr.mxu0 %v680_v0  ;;  %525 = vmatprep.subr.mxu1 %v680_v0  ;;  %v697_v3 = vld [vmem:[%s1076_s1 + $0x70] sm:$0xff]  ;;  %v711_v5 = vld [vmem:[%s1076_s1 + $0x68] sm:$0xff] }
   0x3   :  { %482 = vmatpush3.msra.mxu0 %v685_v1  ;;  %526 = vmatpush3.msra.mxu1 %v685_v1  ;;  %v718_v6 = vld [vmem:[%s1076_s1 + $0xe0] sm:$0xff]  ;;  %v732_v8 = vld [vmem:[%s1076_s1 + $0xd8] sm:$0xff]  ;;  %v746_v10 = vld [vmem:[%s1076_s1 + $0xd0] sm:$0xff] }
   0x4   :  { %483 = vmatprep.subr.mxu0 %v690_v2  ;;  %527 = vmatprep.subr.mxu1 %v690_v2  ;;  %v725_v7 = vld [vmem:[%s1076_s1 + $0x60] sm:$0xff]  ;;  %v739_v9 = vld [vmem:[%s1076_s1 + $0x58] sm:$0xff]  ;;  %v753_v11 = vld [vmem:[%s1076_s1 + $0x50] sm:$0xff] }
   0x5   :  { %484 = vmatpush3.msra.mxu0 %v697_v3  ;;  %528 = vmatpush3.msra.mxu1 %v697_v3  ;;  %v760_v12 = vld [vmem:[%s1076_s1 + $0xc8] sm:$0xff]  ;;  %v774_v14 = vld [vmem:[%s1076_s1 + $0xc0] sm:$0xff]  ;;  %v788_v16 = vld [vmem:[%s1076_s1 + $0xb8] sm:$0xff] }
   0x6   :  { %485 = vmatprep.subr.mxu0 %v704_v4  ;;  %529 = vmatprep.subr.mxu1 %v704_v4  ;;  %v767_v13 = vld [vmem:[%s1076_s1 + $0x48] sm:$0xff]  ;;  %v781_v15 = vld [vmem:[%s1076_s1 + $0x40] sm:$0xff]  ;;  %v795_v17 = vld [vmem:[%s1076_s1 + $0x38] sm:$0xff] }
   0x7   :  { %486 = vmatpush3.msra.mxu0 %v711_v5  ;;  %530 = vmatpush3.msra.mxu1 %v711_v5  ;;  %v802_v18 = vld [vmem:[%s1076_s1 + $0xb0] sm:$0xff]  ;;  %v816_v20 = vld [vmem:[%s1076_s1 + $0xa8] sm:$0xff]  ;;  %v830_v22 = vld [vmem:[%s1076_s1 + $0xa0] sm:$0xff] }
   0x8   :  { %487 = vmatprep.subr.mxu0 %v718_v6  ;;  %531 = vmatprep.subr.mxu1 %v718_v6  ;;  %v809_v19 = vld [vmem:[%s1076_s1 + $0x30] sm:$0xff]  ;;  %v823_v21 = vld [vmem:[%s1076_s1 + $0x28] sm:$0xff]  ;;  %v837_v23 = vld [vmem:[%s1076_s1 + $0x20] sm:$0xff] }
   0x9   :  { %488 = vmatpush3.msra.mxu0 %v725_v7  ;;  %532 = vmatpush3.msra.mxu1 %v725_v7  ;;  %v844_v24 = vld [vmem:[%s1076_s1 + $0x98] sm:$0xff]  ;;  %v858_v26 = vld [vmem:[%s1076_s1 + $0x90] sm:$0xff]  ;;  %v872_v28 = vld [vmem:[%s1076_s1 + $0x88] sm:$0xff] }
   0xa   :  { %489 = vmatprep.subr.mxu0 %v732_v8  ;;  %533 = vmatprep.subr.mxu1 %v732_v8  ;;  %v851_v25 = vld [vmem:[%s1076_s1 + $0x18] sm:$0xff]  ;;  %v865_v27 = vld [vmem:[%s1076_s1 + $0x10] sm:$0xff]  ;;  %v879_v29 = vld [vmem:[%s1076_s1 + $0x8] sm:$0xff] }
   0xb   :  { %490 = vmatpush3.msra.mxu0 %v739_v9  ;;  %534 = vmatpush3.msra.mxu1 %v739_v9  ;;  %v886_v30 = vld [vmem:[%s1076_s1 + $0x80] sm:$0xff]  ;;  %v47_v32 = vld [vmem:[%s1077_s0 + $0x8] sm:$0xff]  ;;  %v49_v36 = vld [vmem:[%s1077_s0 + $0x18] sm:$0xff] }
   0xc   :  { %491 = vmatprep.subr.mxu0 %v746_v10  ;;  %535 = vmatprep.subr.mxu1 %v746_v10  ;;  %v893_v31 = vld [vmem:[%s1076_s1] sm:$0xff]  ;;  %v457_v33 = vld [vmem:[%s1077_s0 + $0x48] sm:$0xff]  ;;  %v459_v37 = vld [vmem:[%s1077_s0 + $0x58] sm:$0xff] }
   0xd   :  { %492 = vmatpush3.msra.mxu0 %v753_v11  ;;  %536 = vmatpush3.msra.mxu1 %v753_v11  ;;  %v46_v34 = vld [vmem:[%s1077_s0] sm:$0xff]  ;;  %v48_v38 = vld [vmem:[%s1077_s0 + $0x10] sm:$0xff]  ;;  %v51_v40 = vld [vmem:[%s1077_s0 + $0x28] sm:$0xff] }
   0xe   :  { %493 = vmatprep.subr.mxu0 %v760_v12  ;;  %537 = vmatprep.subr.mxu1 %v760_v12  ;;  %v456_v35 = vld [vmem:[%s1077_s0 + $0x40] sm:$0xff]  ;;  %v458_v39 = vld [vmem:[%s1077_s0 + $0x50] sm:$0xff]  ;;  %v461_v41 = vld [vmem:[%s1077_s0 + $0x68] sm:$0xff] }
   0xf   :  { %494 = vmatpush3.msra.mxu0 %v767_v13  ;;  %538 = vmatpush3.msra.mxu1 %v767_v13  ;;  %v50_v42 = vld [vmem:[%s1077_s0 + $0x20] sm:$0xff]  ;;  %v53_v44 = vld [vmem:[%s1077_s0 + $0x38] sm:$0xff]  ;;  %v52_v46 = vld [vmem:[%s1077_s0 + $0x30] sm:$0xff] }
  0x10   :  { %495 = vmatprep.subr.mxu0 %v774_v14  ;;  %539 = vmatprep.subr.mxu1 %v774_v14  ;;  %v460_v43 = vld [vmem:[%s1077_s0 + $0x60] sm:$0xff]  ;;  %v463_v45 = vld [vmem:[%s1077_s0 + $0x78] sm:$0xff]  ;;  %v462_v47 = vld [vmem:[%s1077_s0 + $0x70] sm:$0xff] }
  0x11   :  { %496 = vmatpush3.msra.mxu0 %v781_v15  ;;  %540 = vmatpush3.msra.mxu1 %v781_v15  ;;  %v465_v48 = vld [vmem:[%s1077_s0 + $0x88] sm:$0xff]  ;;  %v464_v50 = vld [vmem:[%s1077_s0 + $0x80] sm:$0xff]  ;;  %v467_v52 = vld [vmem:[%s1077_s0 + $0x98] sm:$0xff] }
  0x12   :  { %497 = vmatprep.subr.mxu0 %v788_v16  ;;  %541 = vmatprep.subr.mxu1 %v788_v16  ;;  %v473_v49 = vld [vmem:[%s1077_s0 + $0xc8] sm:$0xff]  ;;  %v472_v51 = vld [vmem:[%s1077_s0 + $0xc0] sm:$0xff]  ;;  %v475_v53 = vld [vmem:[%s1077_s0 + $0xd8] sm:$0xff] }
  0x13   :  { %498 = vmatpush3.msra.mxu0 %v795_v17  ;;  %542 = vmatpush3.msra.mxu1 %v795_v17  ;;  %v466_v54 = vld [vmem:[%s1077_s0 + $0x90] sm:$0xff]  ;;  %v469_v56 = vld [vmem:[%s1077_s0 + $0xa8] sm:$0xff]  ;;  %v468_v58 = vld [vmem:[%s1077_s0 + $0xa0] sm:$0xff] }
  0x14   :  { %499 = vmatprep.subr.mxu0 %v802_v18  ;;  %543 = vmatprep.subr.mxu1 %v802_v18  ;;  %v474_v55 = vld [vmem:[%s1077_s0 + $0xd0] sm:$0xff]  ;;  %v477_v57 = vld [vmem:[%s1077_s0 + $0xe8] sm:$0xff]  ;;  %v476_v59 = vld [vmem:[%s1077_s0 + $0xe0] sm:$0xff] }
  0x15   :  { %500 = vmatpush3.msra.mxu0 %v809_v19  ;;  %544 = vmatpush3.msra.mxu1 %v809_v19  ;;  %v471_v60 = vld [vmem:[%s1077_s0 + $0xb8] sm:$0xff]  ;;  %v470_v62 = vld [vmem:[%s1077_s0 + $0xb0] sm:$0xff] }
  0x16   :  { %501 = vmatprep.subr.mxu0 %v816_v20  ;;  %545 = vmatprep.subr.mxu1 %v816_v20  ;;  %v479_v61 = vld [vmem:[%s1077_s0 + $0xf8] sm:$0xff]  ;;  %v478_v63 = vld [vmem:[%s1077_s0 + $0xf0] sm:$0xff] }
  0x17   :  { %502 = vmatpush3.msra.mxu0 %v823_v21  ;;  %546 = vmatpush3.msra.mxu1 %v823_v21 }
  0x18   :  { %503 = vmatprep.subr.mxu0 %v830_v22  ;;  %547 = vmatprep.subr.mxu1 %v830_v22 }
  0x19   :  { %504 = vmatpush3.msra.mxu0 %v837_v23  ;;  %548 = vmatpush3.msra.mxu1 %v837_v23 }
  0x1a   :  { %505 = vmatprep.subr.mxu0 %v844_v24  ;;  %549 = vmatprep.subr.mxu1 %v844_v24 }
  0x1b   :  { %506 = vmatpush3.msra.mxu0 %v851_v25  ;;  %550 = vmatpush3.msra.mxu1 %v851_v25 }
  0x1c   :  { %507 = vmatprep.subr.mxu0 %v858_v26  ;;  %551 = vmatprep.subr.mxu1 %v858_v26 }
  0x1d   :  { %508 = vmatpush3.msra.mxu0 %v865_v27  ;;  %552 = vmatpush3.msra.mxu1 %v865_v27 }
  0x1e   :  { %509 = vmatprep.subr.mxu0 %v872_v28  ;;  %553 = vmatprep.subr.mxu1 %v872_v28 }
  0x1f   :  { %510 = vmatpush3.msra.mxu0 %v879_v29  ;;  %554 = vmatpush3.msra.mxu1 %v879_v29 }
  0x20   :  { %511 = vmatprep.subr.mxu0 %v886_v30  ;;  %555 = vmatprep.subr.mxu1 %v886_v30 }
  0x21   :  { %512 = vmatpush3.msra.mxu0 %v893_v31  ;;  %118 = vmatprep.mubr.f32.mxu0 %v47_v32  ;;  %v480_v32 = vld [vmem:[%s1078_s2] ss:$0 sm:$0xff] }
  0x22   :  { %556 = vmatpush3.msra.mxu1 %v893_v31  ;;  %212 = vmatprep.mubr.f32.mxu1 %v457_v33 }
  0x23   :  { %119 = vmatmul.mubr.f32.vlgmr.msra.gmra.mxu0 %v46_v34  ;;  %213 = vmatmul.mubr.f32.vlgmr.msra.gmra.mxu1 %v456_v35 }
  0x24   :  { %569 = vmatprep.subr.mxu0 %v680_v0  ;;  %613 = vmatprep.subr.mxu1 %v680_v0 }
  0x25   :  { %570 = vmatpush3.msra.mxu0 %v685_v1  ;;  %614 = vmatpush3.msra.mxu1 %v685_v1 }
  0x26   :  { %571 = vmatprep.subr.mxu0 %v690_v2  ;;  %615 = vmatprep.subr.mxu1 %v690_v2 }
  0x27   :  { %572 = vmatpush3.msra.mxu0 %v697_v3  ;;  %616 = vmatpush3.msra.mxu1 %v697_v3 }
  0x28   :  { %573 = vmatprep.subr.mxu0 %v704_v4  ;;  %617 = vmatprep.subr.mxu1 %v704_v4 }
  0x29   :  { %574 = vmatpush3.msra.mxu0 %v711_v5  ;;  %618 = vmatpush3.msra.mxu1 %v711_v5 }
  0x2a   :  { %575 = vmatprep.subr.mxu0 %v718_v6  ;;  %619 = vmatprep.subr.mxu1 %v718_v6 }
  0x2b   :  { %576 = vmatpush3.msra.mxu0 %v725_v7  ;;  %620 = vmatpush3.msra.mxu1 %v725_v7 }
  0x2c   :  { %577 = vmatprep.subr.mxu0 %v732_v8  ;;  %621 = vmatprep.subr.mxu1 %v732_v8 }
  0x2d   :  { %578 = vmatpush3.msra.mxu0 %v739_v9  ;;  %622 = vmatpush3.msra.mxu1 %v739_v9 }
  0x2e   :  { %579 = vmatprep.subr.mxu0 %v746_v10  ;;  %623 = vmatprep.subr.mxu1 %v746_v10 }
  0x2f   :  { %580 = vmatpush3.msra.mxu0 %v753_v11  ;;  %624 = vmatpush3.msra.mxu1 %v753_v11 }
  0x30   :  { %581 = vmatprep.subr.mxu0 %v760_v12  ;;  %625 = vmatprep.subr.mxu1 %v760_v12 }
  0x31   :  { %582 = vmatpush3.msra.mxu0 %v767_v13  ;;  %626 = vmatpush3.msra.mxu1 %v767_v13 }
  0x32   :  { %583 = vmatprep.subr.mxu0 %v774_v14  ;;  %627 = vmatprep.subr.mxu1 %v774_v14 }
  0x33   :  { %584 = vmatpush3.msra.mxu0 %v781_v15  ;;  %628 = vmatpush3.msra.mxu1 %v781_v15 }
  0x34   :  { %585 = vmatprep.subr.mxu0 %v788_v16  ;;  %629 = vmatprep.subr.mxu1 %v788_v16 }
  0x35   :  { %123 = vmatprep.mubr.f32.mxu0 %v49_v36  ;;  %217 = vmatprep.mubr.f32.mxu1 %v459_v37 }
  0x36   :  { %586 = vmatpush3.msra.mxu0 %v795_v17  ;;  %630 = vmatpush3.msra.mxu1 %v795_v17 }
  0x37   :  { %124 = vmatmul.mubr.f32.gmra.mxu0 %v48_v38  ;;  %218 = vmatmul.mubr.f32.gmra.mxu1 %v458_v39 }
  0x38   :  { %587 = vmatprep.subr.mxu0 %v802_v18  ;;  %631 = vmatprep.subr.mxu1 %v802_v18 }
  0x39   :  { %588 = vmatpush3.msra.mxu0 %v809_v19  ;;  %632 = vmatpush3.msra.mxu1 %v809_v19 }
  0x3a   :  { %589 = vmatprep.subr.mxu0 %v816_v20  ;;  %633 = vmatprep.subr.mxu1 %v816_v20 }
  0x3b   :  { %128 = vmatprep.mubr.f32.mxu0 %v51_v40  ;;  %222 = vmatprep.mubr.f32.mxu1 %v461_v41 }
  0x3c   :  { %590 = vmatpush3.msra.mxu0 %v823_v21  ;;  %634 = vmatpush3.msra.mxu1 %v823_v21 }
  0x3d   :  { %129 = vmatmul.mubr.f32.gmra.mxu0 %v50_v42  ;;  %223 = vmatmul.mubr.f32.gmra.mxu1 %v460_v43 }
  0x3e   :  { %591 = vmatprep.subr.mxu0 %v830_v22  ;;  %635 = vmatprep.subr.mxu1 %v830_v22 }
  0x3f   :  { %592 = vmatpush3.msra.mxu0 %v837_v23  ;;  %636 = vmatpush3.msra.mxu1 %v837_v23 }
  0x40   :  { %593 = vmatprep.subr.mxu0 %v844_v24  ;;  %637 = vmatprep.subr.mxu1 %v844_v24 }
  0x41   :  { %133 = vmatprep.mubr.f32.mxu0 %v53_v44  ;;  %227 = vmatprep.mubr.f32.mxu1 %v463_v45 }
  0x42   :  { %594 = vmatpush3.msra.mxu0 %v851_v25  ;;  %638 = vmatpush3.msra.mxu1 %v851_v25 }
  0x43   :  { %134 = vmatmul.mubr.f32.gmra.mxu0 %v52_v46  ;;  %228 = vmatmul.mubr.f32.gmra.mxu1 %v462_v47 }
  0x44   :  { %595 = vmatprep.subr.mxu0 %v858_v26  ;;  %639 = vmatprep.subr.mxu1 %v858_v26 }
  0x45   :  { %596 = vmatpush3.msra.mxu0 %v865_v27  ;;  %640 = vmatpush3.msra.mxu1 %v865_v27 }
  0x46   :  { %597 = vmatprep.subr.mxu0 %v872_v28  ;;  %641 = vmatprep.subr.mxu1 %v872_v28 }
  0x47   :  { %598 = vmatpush3.msra.mxu0 %v879_v29  ;;  %642 = vmatpush3.msra.mxu1 %v879_v29 }
  0x48   :  { %599 = vmatprep.subr.mxu0 %v886_v30  ;;  %643 = vmatprep.subr.mxu1 %v886_v30 }
  0x49   :  { %600 = vmatpush3.msra.mxu0 %v893_v31  ;;  %310 = vmatprep.mubr.f32.mxu0 %v465_v48 }
  0x4a   :  { %644 = vmatpush3.msra.mxu1 %v893_v31  ;;  %408 = vmatprep.mubr.f32.mxu1 %v473_v49 }
  0x4b   :  { %311 = vmatmul.mubr.f32.vlgmr.msra.gmra.mxu0 %v464_v50  ;;  %409 = vmatmul.mubr.f32.vlgmr.msra.gmra.mxu1 %v472_v51 }
  0x4c   :  { %315 = vmatprep.mubr.f32.mxu0 %v467_v52  ;;  %413 = vmatprep.mubr.f32.mxu1 %v475_v53 }
  0x4f   :  { %316 = vmatmul.mubr.f32.gmra.mxu0 %v466_v54  ;;  %414 = vmatmul.mubr.f32.gmra.mxu1 %v474_v55 }
  0x50   :  { %320 = vmatprep.mubr.f32.mxu0 %v469_v56  ;;  %418 = vmatprep.mubr.f32.mxu1 %v477_v57 }
  0x53   :  { %321 = vmatmul.mubr.f32.gmra.mxu0 %v468_v58  ;;  %419 = vmatmul.mubr.f32.gmra.mxu1 %v476_v59 }
  0x54   :  { %325 = vmatprep.mubr.f32.mxu0 %v471_v60  ;;  %423 = vmatprep.mubr.f32.mxu1 %v479_v61 }
  0x57   :  { %326 = vmatmul.mubr.f32.gmra.mxu0 %v470_v62  ;;  %424 = vmatmul.mubr.f32.gmra.mxu1 %v478_v63 }
  0xe3   :  { %v513_v0 = vpop.f32.mrf.mxu0  ;;  %v557_v1 = vpop.f32.mrf.mxu1 }
  0xe5   :  { %v514_v2 = vpop.f32.mrf.mxu0  ;;  %v558_v3 = vpop.f32.mrf.mxu1 }
  0xe6   :  { %v515_v16 = vadd.f32 %v514_v2, %v513_v0  ;;  %v559_v17 = vadd.f32 %v558_v3, %v557_v1 }
  0xe8   :  { %v233_v22 = vmax.f32 %v515_v16, %v559_v17 }
  0xf7   :  { %v516_v4 = vpop.f32.mrf.mxu0  ;;  %v560_v5 = vpop.f32.mrf.mxu1 }
  0xf9   :  { %v517_v6 = vpop.f32.mrf.mxu0  ;;  %v561_v7 = vpop.f32.mrf.mxu1 }
  0xfa   :  { %v518_v23 = vadd.f32 %v517_v6, %v516_v4  ;;  %v562_v24 = vadd.f32 %v561_v7, %v560_v5 }
  0xfc   :  { %v234_v35 = vmax.f32 %v518_v23, %v562_v24 }
  0xfd   :  { %v519_v8 = vpop.f32.mrf.mxu0  ;;  %v563_v9 = vpop.f32.mrf.mxu1 }
  0xff   :  { %v520_v10 = vpop.f32.mrf.mxu0  ;;  %v564_v11 = vpop.f32.mrf.mxu1 }
 0x100   :  { %v521_v30 = vadd.f32 %v520_v10, %v519_v8  ;;  %v565_v31 = vadd.f32 %v564_v11, %v563_v9 }
 0x102   :  { %v235_v43 = vmax.f32 %v521_v30, %v565_v31 }
 0x103   :  { %v522_v12 = vpop.f32.mrf.mxu0  ;;  %v566_v13 = vpop.f32.mrf.mxu1 }
 0x105   :  { %v523_v14 = vpop.f32.mrf.mxu0  ;;  %v567_v15 = vpop.f32.mrf.mxu1 }
 0x106   :  { %v524_v44 = vadd.f32 %v523_v14, %v522_v12  ;;  %v568_v47 = vadd.f32 %v567_v15, %v566_v13 }
 0x108   :  { %v236_v58 = vmax.f32 %v524_v44, %v568_v47 }
 0x10b   :  { %v601_v18 = vpop.f32.mrf.mxu0  ;;  %v645_v19 = vpop.f32.mrf.mxu1 }
 0x10d   :  { %v602_v20 = vpop.f32.mrf.mxu0  ;;  %v646_v21 = vpop.f32.mrf.mxu1 }
 0x10e   :  { %v603_v25 = vadd.f32 %v602_v20, %v601_v18  ;;  %v647_v29 = vadd.f32 %v646_v21, %v645_v19 }
 0x10f   :  { %v604_v26 = vpop.f32.mrf.mxu0  ;;  %v648_v27 = vpop.f32.mrf.mxu1 }
 0x110   :  { %v331_v28 = vmax.f32 %v233_v22, %v603_v25 }
 0x111   :  { %v605_v33 = vpop.f32.mrf.mxu0  ;;  %v649_v34 = vpop.f32.mrf.mxu1 }
 0x112   :  { %v429_v36 = vmax.f32 %v331_v28, %v647_v29  ;;  %v606_v37 = vadd.f32 %v605_v33, %v604_v26  ;;  %v650_v42 = vadd.f32 %v649_v34, %v648_v27 }
 0x113   :  { %v607_v38 = vpop.f32.mrf.mxu0  ;;  %v651_v39 = vpop.f32.mrf.mxu1 }
 0x114   :  { %v440_v40 = vadd.f32 %v480_v32, %v429_v36  ;;  %v332_v41 = vmax.f32 %v234_v35, %v606_v37 }
 0x115   :  { %v608_v45 = vpop.f32.mrf.mxu0  ;;  %v652_v46 = vpop.f32.mrf.mxu1 }
 0x116   :  { %v444_v48 = vmax.f32 %v440_v40, 0.0  ;;  %v430_v49 = vmax.f32 %v332_v41, %v650_v42  ;;  %v609_v50 = vadd.f32 %v608_v45, %v607_v38  ;;  %v653_v55 = vadd.f32 %v652_v46, %v651_v39 }
 0x117   :  { %v610_v51 = vpop.f32.mrf.mxu0  ;;  %v654_v52 = vpop.f32.mrf.mxu1 }
 0x118   :  { %448 = vst [vmem:[%s1079_s3] sm:$0xff] %v444_v48  ;;  %v441_v53 = vadd.f32 %v480_v32, %v430_v49  ;;  %v333_v54 = vmax.f32 %v235_v43, %v609_v50 }
 0x119   :  { %v611_v56 = vpop.f32.mrf.mxu0  ;;  %v655_v57 = vpop.f32.mrf.mxu1 }
 0x11a   :  { %v445_v59 = vmax.f32 %v441_v53, 0.0  ;;  %v431_v60 = vmax.f32 %v333_v54, %v653_v55  ;;  %v612_v61 = vadd.f32 %v611_v56, %v610_v51  ;;  %v656_v0 = vadd.f32 %v655_v57, %v654_v52 }
 0x11c   :  { %449 = vst [vmem:[%s1079_s3 + $0x8] sm:$0xff] %v445_v59  ;;  %v442_v62 = vadd.f32 %v480_v32, %v431_v60  ;;  %v334_v63 = vmax.f32 %v236_v58, %v612_v61 }
 0x11e   :  { %v446_v1 = vmax.f32 %v442_v62, 0.0  ;;  %v432_v2 = vmax.f32 %v334_v63, %v656_v0 }
 0x120   :  { %450 = vst [vmem:[%s1079_s3 + $0x10] sm:$0xff] %v446_v1  ;;  %v443_v3 = vadd.f32 %v480_v32, %v432_v2 }
 0x122   :  { %v447_v4 = vmax.f32 %v443_v3, 0.0 }
 0x124   :  { %451 = vst [vmem:[%s1079_s3 + $0x18] sm:$0xff] %v447_v4 }

// kernel: lenet_forward.5
= control target key start
LH: loop header
LB: loop body
LE: loop exit
PB: predicated region body
PF: predicated region fallthrough
CT: control target
= control target key end

     0   :  { %vm1448_vm0 = vmmov 0   ;;  %s2447_s1 = inlined_call_operand.vmem [shape: f32[2048,128], index: 1, kind: input, shape index: {}]   ;;  %s2448_s0 = inlined_call_operand.vmem [shape: f32[8,2048], index: 0, kind: input, shape index: {}]   ;;  %s2449_s3 = inlined_call_operand.vmem [shape: f32[128,128], index: 3, kind: input, shape index: {}]   ;;  %s2450_s5 = inlined_call_operand.vmem [shape: f32[128,128], index: 5, kind: input, shape index: {}]   ;;  %s2451_s2 = inlined_call_operand.vmem [shape: f32[1,128], index: 2, kind: input, shape index: {}]   ;;  %s2452_s4 = inlined_call_operand.vmem [shape: f32[1,128], index: 4, kind: input, shape index: {}]   ;;  %s2453_s6 = inlined_call_operand.vmem [shape: f32[1,128], index: 6, kind: input, shape index: {}]   ;;  %s2454_s7 = inlined_call_operand.vmem [shape: f32[8,128], index: 7, kind: output, shape index: {}]  }
   0x1   :  { %v73_v0 = vld [vmem:[%s2447_s1 + $0xf8] sm:$0xff]  ;;  %v72_v4 = vld [vmem:[%s2447_s1 + $0xf0] sm:$0xff]  ;;  %v71_v8 = vld [vmem:[%s2447_s1 + $0xe8] sm:$0xff] }
   0x2   :  { %v105_v1 = vld [vmem:[%s2447_s1 + $0x1f8] sm:$0xff]  ;;  %1061 = vmatprep.subr.mxu0 %v73_v0  ;;  %v104_v5 = vld [vmem:[%s2447_s1 + $0x1f0] sm:$0xff]  ;;  %v103_v9 = vld [vmem:[%s2447_s1 + $0x1e8] sm:$0xff] }
   0x3   :  { %v57_v2 = vld [vmem:[%s2447_s1 + $0x78] sm:$0xff]  ;;  %1096 = vmatprep.subr.mxu1 %v105_v1  ;;  %v56_v6 = vld [vmem:[%s2447_s1 + $0x70] sm:$0xff]  ;;  %v55_v10 = vld [vmem:[%s2447_s1 + $0x68] sm:$0xff] }
   0x4   :  { %v89_v3 = vld [vmem:[%s2447_s1 + $0x178] sm:$0xff]  ;;  %1062 = vmatpush3.msra.mxu0 %v57_v2  ;;  %v88_v7 = vld [vmem:[%s2447_s1 + $0x170] sm:$0xff]  ;;  %v87_v11 = vld [vmem:[%s2447_s1 + $0x168] sm:$0xff] }
   0x5   :  { %1097 = vmatpush3.msra.mxu1 %v89_v3  ;;  %1063 = vmatprep.subr.mxu0 %v72_v4  ;;  %v70_v12 = vld [vmem:[%s2447_s1 + $0xe0] sm:$0xff]  ;;  %v69_v16 = vld [vmem:[%s2447_s1 + $0xd8] sm:$0xff]  ;;  %v68_v20 = vld [vmem:[%s2447_s1 + $0xd0] sm:$0xff] }
   0x6   :  { %1098 = vmatprep.subr.mxu1 %v104_v5  ;;  %1064 = vmatpush3.msra.mxu0 %v56_v6  ;;  %v102_v13 = vld [vmem:[%s2447_s1 + $0x1e0] sm:$0xff]  ;;  %v101_v17 = vld [vmem:[%s2447_s1 + $0x1d8] sm:$0xff]  ;;  %v100_v21 = vld [vmem:[%s2447_s1 + $0x1d0] sm:$0xff] }
   0x7   :  { %1099 = vmatpush3.msra.mxu1 %v88_v7  ;;  %1065 = vmatprep.subr.mxu0 %v71_v8  ;;  %v54_v14 = vld [vmem:[%s2447_s1 + $0x60] sm:$0xff]  ;;  %v53_v18 = vld [vmem:[%s2447_s1 + $0x58] sm:$0xff]  ;;  %v52_v22 = vld [vmem:[%s2447_s1 + $0x50] sm:$0xff] }
   0x8   :  { %1100 = vmatprep.subr.mxu1 %v103_v9  ;;  %v86_v15 = vld [vmem:[%s2447_s1 + $0x160] sm:$0xff]  ;;  %1066 = vmatpush3.msra.mxu0 %v55_v10  ;;  %v85_v19 = vld [vmem:[%s2447_s1 + $0x158] sm:$0xff]  ;;  %v84_v23 = vld [vmem:[%s2447_s1 + $0x150] sm:$0xff] }
   0x9   :  { %1101 = vmatpush3.msra.mxu1 %v87_v11  ;;  %1067 = vmatprep.subr.mxu0 %v70_v12  ;;  %v67_v24 = vld [vmem:[%s2447_s1 + $0xc8] sm:$0xff]  ;;  %v66_v28 = vld [vmem:[%s2447_s1 + $0xc0] sm:$0xff]  ;;  %v65_v32 = vld [vmem:[%s2447_s1 + $0xb8] sm:$0xff] }
   0xa   :  { %1102 = vmatprep.subr.mxu1 %v102_v13  ;;  %1068 = vmatpush3.msra.mxu0 %v54_v14  ;;  %v99_v25 = vld [vmem:[%s2447_s1 + $0x1c8] sm:$0xff]  ;;  %v98_v29 = vld [vmem:[%s2447_s1 + $0x1c0] sm:$0xff]  ;;  %v97_v33 = vld [vmem:[%s2447_s1 + $0x1b8] sm:$0xff] }
   0xb   :  { %1103 = vmatpush3.msra.mxu1 %v86_v15  ;;  %1069 = vmatprep.subr.mxu0 %v69_v16  ;;  %v51_v26 = vld [vmem:[%s2447_s1 + $0x48] sm:$0xff]  ;;  %v50_v30 = vld [vmem:[%s2447_s1 + $0x40] sm:$0xff]  ;;  %v49_v34 = vld [vmem:[%s2447_s1 + $0x38] sm:$0xff] }
   0xc   :  { %1104 = vmatprep.subr.mxu1 %v101_v17  ;;  %1070 = vmatpush3.msra.mxu0 %v53_v18  ;;  %v83_v27 = vld [vmem:[%s2447_s1 + $0x148] sm:$0xff]  ;;  %v82_v31 = vld [vmem:[%s2447_s1 + $0x140] sm:$0xff]  ;;  %v81_v35 = vld [vmem:[%s2447_s1 + $0x138] sm:$0xff] }
   0xd   :  { %1105 = vmatpush3.msra.mxu1 %v85_v19  ;;  %1071 = vmatprep.subr.mxu0 %v68_v20  ;;  %v64_v36 = vld [vmem:[%s2447_s1 + $0xb0] sm:$0xff]  ;;  %v63_v40 = vld [vmem:[%s2447_s1 + $0xa8] sm:$0xff]  ;;  %v62_v44 = vld [vmem:[%s2447_s1 + $0xa0] sm:$0xff] }
   0xe   :  { %1106 = vmatprep.subr.mxu1 %v100_v21  ;;  %1072 = vmatpush3.msra.mxu0 %v52_v22  ;;  %v96_v37 = vld [vmem:[%s2447_s1 + $0x1b0] sm:$0xff]  ;;  %v95_v41 = vld [vmem:[%s2447_s1 + $0x1a8] sm:$0xff]  ;;  %v94_v45 = vld [vmem:[%s2447_s1 + $0x1a0] sm:$0xff] }
   0xf   :  { %1107 = vmatpush3.msra.mxu1 %v84_v23  ;;  %1073 = vmatprep.subr.mxu0 %v67_v24  ;;  %v48_v38 = vld [vmem:[%s2447_s1 + $0x30] sm:$0xff]  ;;  %v47_v42 = vld [vmem:[%s2447_s1 + $0x28] sm:$0xff]  ;;  %v46_v46 = vld [vmem:[%s2447_s1 + $0x20] sm:$0xff] }
  0x10   :  { %1108 = vmatprep.subr.mxu1 %v99_v25  ;;  %1074 = vmatpush3.msra.mxu0 %v51_v26  ;;  %v80_v39 = vld [vmem:[%s2447_s1 + $0x130] sm:$0xff]  ;;  %v79_v43 = vld [vmem:[%s2447_s1 + $0x128] sm:$0xff]  ;;  %v78_v47 = vld [vmem:[%s2447_s1 + $0x120] sm:$0xff] }
  0x11   :  { %1109 = vmatpush3.msra.mxu1 %v83_v27  ;;  %1075 = vmatprep.subr.mxu0 %v66_v28  ;;  %v61_v48 = vld [vmem:[%s2447_s1 + $0x98] sm:$0xff]  ;;  %v60_v52 = vld [vmem:[%s2447_s1 + $0x90] sm:$0xff]  ;;  %v59_v56 = vld [vmem:[%s2447_s1 + $0x88] sm:$0xff] }
  0x12   :  { %1110 = vmatprep.subr.mxu1 %v98_v29  ;;  %1076 = vmatpush3.msra.mxu0 %v50_v30  ;;  %v93_v49 = vld [vmem:[%s2447_s1 + $0x198] sm:$0xff]  ;;  %v92_v53 = vld [vmem:[%s2447_s1 + $0x190] sm:$0xff]  ;;  %v91_v57 = vld [vmem:[%s2447_s1 + $0x188] sm:$0xff] }
  0x13   :  { %1111 = vmatpush3.msra.mxu1 %v82_v31  ;;  %1077 = vmatprep.subr.mxu0 %v65_v32  ;;  %v45_v50 = vld [vmem:[%s2447_s1 + $0x18] sm:$0xff]  ;;  %v44_v54 = vld [vmem:[%s2447_s1 + $0x10] sm:$0xff]  ;;  %v43_v58 = vld [vmem:[%s2447_s1 + $0x8] sm:$0xff] }
  0x14   :  { %1112 = vmatprep.subr.mxu1 %v97_v33  ;;  %1078 = vmatpush3.msra.mxu0 %v49_v34  ;;  %v77_v51 = vld [vmem:[%s2447_s1 + $0x118] sm:$0xff]  ;;  %v76_v55 = vld [vmem:[%s2447_s1 + $0x110] sm:$0xff]  ;;  %v75_v59 = vld [vmem:[%s2447_s1 + $0x108] sm:$0xff] }
  0x15   :  { %1113 = vmatpush3.msra.mxu1 %v81_v35  ;;  %1079 = vmatprep.subr.mxu0 %v64_v36  ;;  %v58_v60 = vld [vmem:[%s2447_s1 + $0x80] sm:$0xff]  ;;  %v27_v63 = vld [vmem:[%s2448_s0 + $0x8] sm:$0xff]  ;;  %v29_v2 = vld [vmem:[%s2448_s0 + $0x18] sm:$0xff] }
  0x16   :  { %1114 = vmatprep.subr.mxu1 %v96_v37  ;;  %1080 = vmatpush3.msra.mxu0 %v48_v38  ;;  %v90_v61 = vld [vmem:[%s2447_s1 + $0x180] sm:$0xff]  ;;  %v137_v3 = vld [vmem:[%s2447_s1 + $0x2f8] sm:$0xff]  ;;  %v28_v5 = vld [vmem:[%s2448_s0 + $0x10] sm:$0xff] }
  0x17   :  { %1115 = vmatpush3.msra.mxu1 %v80_v39  ;;  %1081 = vmatprep.subr.mxu0 %v63_v40  ;;  %v42_v62 = vld [vmem:[%s2447_s1] sm:$0xff]  ;;  %v169_v4 = vld [vmem:[%s2447_s1 + $0x3f8] sm:$0xff]  ;;  %v136_v8 = vld [vmem:[%s2447_s1 + $0x2f0] sm:$0xff] }
  0x18   :  { %1116 = vmatprep.subr.mxu1 %v95_v41  ;;  %1082 = vmatpush3.msra.mxu0 %v47_v42  ;;  %v74_v0 = vld [vmem:[%s2447_s1 + $0x100] sm:$0xff]  ;;  %v121_v6 = vld [vmem:[%s2447_s1 + $0x278] sm:$0xff]  ;;  %v168_v9 = vld [vmem:[%s2447_s1 + $0x3f0] sm:$0xff] }
  0x19   :  { %1117 = vmatpush3.msra.mxu1 %v79_v43  ;;  %1083 = vmatprep.subr.mxu0 %v62_v44  ;;  %v26_v1 = vld [vmem:[%s2448_s0] sm:$0xff]  ;;  %v153_v7 = vld [vmem:[%s2447_s1 + $0x378] sm:$0xff]  ;;  %v120_v10 = vld [vmem:[%s2447_s1 + $0x270] sm:$0xff] }
  0x1a   :  { %1118 = vmatprep.subr.mxu1 %v94_v45  ;;  %1084 = vmatpush3.msra.mxu0 %v46_v46  ;;  %v152_v11 = vld [vmem:[%s2447_s1 + $0x370] sm:$0xff]  ;;  %v135_v12 = vld [vmem:[%s2447_s1 + $0x2e8] sm:$0xff]  ;;  %v134_v16 = vld [vmem:[%s2447_s1 + $0x2e0] sm:$0xff] }
  0x1b   :  { %1119 = vmatpush3.msra.mxu1 %v78_v47  ;;  %1085 = vmatprep.subr.mxu0 %v61_v48  ;;  %v167_v13 = vld [vmem:[%s2447_s1 + $0x3e8] sm:$0xff]  ;;  %v166_v17 = vld [vmem:[%s2447_s1 + $0x3e0] sm:$0xff]  ;;  %v133_v20 = vld [vmem:[%s2447_s1 + $0x2d8] sm:$0xff] }
  0x1c   :  { %1120 = vmatprep.subr.mxu1 %v93_v49  ;;  %1086 = vmatpush3.msra.mxu0 %v45_v50  ;;  %v119_v14 = vld [vmem:[%s2447_s1 + $0x268] sm:$0xff]  ;;  %v118_v18 = vld [vmem:[%s2447_s1 + $0x260] sm:$0xff]  ;;  %v165_v21 = vld [vmem:[%s2447_s1 + $0x3d8] sm:$0xff] }
  0x1d   :  { %1121 = vmatpush3.msra.mxu1 %v77_v51  ;;  %1087 = vmatprep.subr.mxu0 %v60_v52  ;;  %v151_v15 = vld [vmem:[%s2447_s1 + $0x368] sm:$0xff]  ;;  %v150_v19 = vld [vmem:[%s2447_s1 + $0x360] sm:$0xff]  ;;  %v117_v22 = vld [vmem:[%s2447_s1 + $0x258] sm:$0xff] }
  0x1e   :  { %1122 = vmatprep.subr.mxu1 %v92_v53  ;;  %1088 = vmatpush3.msra.mxu0 %v44_v54  ;;  %v149_v23 = vld [vmem:[%s2447_s1 + $0x358] sm:$0xff]  ;;  %v132_v24 = vld [vmem:[%s2447_s1 + $0x2d0] sm:$0xff]  ;;  %v131_v28 = vld [vmem:[%s2447_s1 + $0x2c8] sm:$0xff] }
  0x1f   :  { %1123 = vmatpush3.msra.mxu1 %v76_v55  ;;  %1089 = vmatprep.subr.mxu0 %v59_v56  ;;  %v164_v25 = vld [vmem:[%s2447_s1 + $0x3d0] sm:$0xff]  ;;  %v163_v29 = vld [vmem:[%s2447_s1 + $0x3c8] sm:$0xff]  ;;  %v130_v32 = vld [vmem:[%s2447_s1 + $0x2c0] sm:$0xff] }
  0x20   :  { %1124 = vmatprep.subr.mxu1 %v91_v57  ;;  %1090 = vmatpush3.msra.mxu0 %v43_v58  ;;  %v116_v26 = vld [vmem:[%s2447_s1 + $0x250] sm:$0xff]  ;;  %v115_v30 = vld [vmem:[%s2447_s1 + $0x248] sm:$0xff]  ;;  %v162_v33 = vld [vmem:[%s2447_s1 + $0x3c0] sm:$0xff] }
  0x21   :  { %1125 = vmatpush3.msra.mxu1 %v75_v59  ;;  %1091 = vmatprep.subr.mxu0 %v58_v60  ;;  %v148_v27 = vld [vmem:[%s2447_s1 + $0x350] sm:$0xff]  ;;  %v147_v31 = vld [vmem:[%s2447_s1 + $0x348] sm:$0xff]  ;;  %v114_v34 = vld [vmem:[%s2447_s1 + $0x240] sm:$0xff] }
  0x22   :  { %1126 = vmatprep.subr.mxu1 %v90_v61  ;;  %1092 = vmatpush3.msra.mxu0 %v42_v62  ;;  %v146_v35 = vld [vmem:[%s2447_s1 + $0x340] sm:$0xff]  ;;  %v129_v36 = vld [vmem:[%s2447_s1 + $0x2b8] sm:$0xff]  ;;  %v128_v40 = vld [vmem:[%s2447_s1 + $0x2b0] sm:$0xff] }
  0x23   :  { %369 = vmatprep.mubr.f32.mxu0 %v27_v63  ;;  %1127 = vmatpush3.msra.mxu1 %v74_v0  ;;  %v161_v37 = vld [vmem:[%s2447_s1 + $0x3b8] sm:$0xff]  ;;  %v160_v41 = vld [vmem:[%s2447_s1 + $0x3b0] sm:$0xff]  ;;  %v127_v44 = vld [vmem:[%s2447_s1 + $0x2a8] sm:$0xff] }
  0x24   :  { %370 = vmatmul.mubr.f32.vlgmr.msra.gmra.mxu0 %v26_v1  ;;  %439 = vmatprep.mubr.f32.mxu1 %v29_v2  ;;  %v113_v38 = vld [vmem:[%s2447_s1 + $0x238] sm:$0xff]  ;;  %v112_v42 = vld [vmem:[%s2447_s1 + $0x230] sm:$0xff]  ;;  %v159_v45 = vld [vmem:[%s2447_s1 + $0x3a8] sm:$0xff] }
  0x25   :  { %1131 = vmatprep.subr.mxu0 %v137_v3  ;;  %1166 = vmatprep.subr.mxu1 %v169_v4  ;;  %v145_v39 = vld [vmem:[%s2447_s1 + $0x338] sm:$0xff]  ;;  %v144_v43 = vld [vmem:[%s2447_s1 + $0x330] sm:$0xff]  ;;  %v111_v46 = vld [vmem:[%s2447_s1 + $0x228] sm:$0xff] }
  0x26   :  { %440 = vmatmul.mubr.f32.vlgmr.msra.gmra.mxu1 %v28_v5  ;;  %1132 = vmatpush3.msra.mxu0 %v121_v6  ;;  %v143_v47 = vld [vmem:[%s2447_s1 + $0x328] sm:$0xff]  ;;  %v126_v48 = vld [vmem:[%s2447_s1 + $0x2a0] sm:$0xff]  ;;  %v125_v52 = vld [vmem:[%s2447_s1 + $0x298] sm:$0xff] }
  0x27   :  { %1167 = vmatpush3.msra.mxu1 %v153_v7  ;;  %1133 = vmatprep.subr.mxu0 %v136_v8  ;;  %v158_v49 = vld [vmem:[%s2447_s1 + $0x3a0] sm:$0xff]  ;;  %v157_v53 = vld [vmem:[%s2447_s1 + $0x398] sm:$0xff]  ;;  %v124_v56 = vld [vmem:[%s2447_s1 + $0x290] sm:$0xff] }
  0x28   :  { %1168 = vmatprep.subr.mxu1 %v168_v9  ;;  %1134 = vmatpush3.msra.mxu0 %v120_v10  ;;  %v110_v50 = vld [vmem:[%s2447_s1 + $0x220] sm:$0xff]  ;;  %v109_v54 = vld [vmem:[%s2447_s1 + $0x218] sm:$0xff]  ;;  %v156_v57 = vld [vmem:[%s2447_s1 + $0x390] sm:$0xff] }
  0x29   :  { %1169 = vmatpush3.msra.mxu1 %v152_v11  ;;  %1135 = vmatprep.subr.mxu0 %v135_v12  ;;  %v142_v51 = vld [vmem:[%s2447_s1 + $0x320] sm:$0xff]  ;;  %v141_v55 = vld [vmem:[%s2447_s1 + $0x318] sm:$0xff]  ;;  %v108_v58 = vld [vmem:[%s2447_s1 + $0x210] sm:$0xff] }
  0x2a   :  { %1170 = vmatprep.subr.mxu1 %v167_v13  ;;  %1136 = vmatpush3.msra.mxu0 %v119_v14  ;;  %v140_v59 = vld [vmem:[%s2447_s1 + $0x310] sm:$0xff]  ;;  %v123_v60 = vld [vmem:[%s2447_s1 + $0x288] sm:$0xff]  ;;  %v122_v0 = vld [vmem:[%s2447_s1 + $0x280] sm:$0xff] }
  0x2b   :  { %1171 = vmatpush3.msra.mxu1 %v151_v15  ;;  %1137 = vmatprep.subr.mxu0 %v134_v16  ;;  %v155_v61 = vld [vmem:[%s2447_s1 + $0x388] sm:$0xff]  ;;  %v154_v1 = vld [vmem:[%s2447_s1 + $0x380] sm:$0xff]  ;;  %v33_v6 = vld [vmem:[%s2448_s0 + $0x38] sm:$0xff] }
  0x2c   :  { %1172 = vmatprep.subr.mxu1 %v166_v17  ;;  %1138 = vmatpush3.msra.mxu0 %v118_v18  ;;  %v107_v62 = vld [vmem:[%s2447_s1 + $0x208] sm:$0xff]  ;;  %v106_v2 = vld [vmem:[%s2447_s1 + $0x200] sm:$0xff]  ;;  %v201_v7 = vld [vmem:[%s2447_s1 + $0x4f8] sm:$0xff] }
  0x2d   :  { %1173 = vmatpush3.msra.mxu1 %v150_v19  ;;  %1139 = vmatprep.subr.mxu0 %v133_v20  ;;  %v139_v63 = vld [vmem:[%s2447_s1 + $0x308] sm:$0xff]  ;;  %v138_v4 = vld [vmem:[%s2447_s1 + $0x300] sm:$0xff]  ;;  %v233_v8 = vld [vmem:[%s2447_s1 + $0x5f8] sm:$0xff] }
  0x2e   :  { %1174 = vmatprep.subr.mxu1 %v165_v21  ;;  %1140 = vmatpush3.msra.mxu0 %v117_v22  ;;  %v31_v3 = vld [vmem:[%s2448_s0 + $0x28] sm:$0xff]  ;;  %v30_v5 = vld [vmem:[%s2448_s0 + $0x20] sm:$0xff]  ;;  %v32_v9 = vld [vmem:[%s2448_s0 + $0x30] sm:$0xff] }
  0x2f   :  { %1175 = vmatpush3.msra.mxu1 %v149_v23  ;;  %1141 = vmatprep.subr.mxu0 %v132_v24  ;;  %v185_v10 = vld [vmem:[%s2447_s1 + $0x478] sm:$0xff]  ;;  %v200_v12 = vld [vmem:[%s2447_s1 + $0x4f0] sm:$0xff]  ;;  %v199_v16 = vld [vmem:[%s2447_s1 + $0x4e8] sm:$0xff] }
  0x30   :  { %1176 = vmatprep.subr.mxu1 %v164_v25  ;;  %1142 = vmatpush3.msra.mxu0 %v116_v26  ;;  %v217_v11 = vld [vmem:[%s2447_s1 + $0x578] sm:$0xff]  ;;  %v232_v13 = vld [vmem:[%s2447_s1 + $0x5f0] sm:$0xff]  ;;  %v231_v17 = vld [vmem:[%s2447_s1 + $0x5e8] sm:$0xff] }
  0x31   :  { %1177 = vmatpush3.msra.mxu1 %v148_v27  ;;  %1143 = vmatprep.subr.mxu0 %v131_v28  ;;  %v184_v14 = vld [vmem:[%s2447_s1 + $0x470] sm:$0xff]  ;;  %v183_v18 = vld [vmem:[%s2447_s1 + $0x468] sm:$0xff]  ;;  %v198_v20 = vld [vmem:[%s2447_s1 + $0x4e0] sm:$0xff] }
  0x32   :  { %1178 = vmatprep.subr.mxu1 %v163_v29  ;;  %1144 = vmatpush3.msra.mxu0 %v115_v30  ;;  %v216_v15 = vld [vmem:[%s2447_s1 + $0x570] sm:$0xff]  ;;  %v215_v19 = vld [vmem:[%s2447_s1 + $0x568] sm:$0xff]  ;;  %v230_v21 = vld [vmem:[%s2447_s1 + $0x5e0] sm:$0xff] }
  0x33   :  { %1179 = vmatpush3.msra.mxu1 %v147_v31  ;;  %1145 = vmatprep.subr.mxu0 %v130_v32  ;;  %v182_v22 = vld [vmem:[%s2447_s1 + $0x460] sm:$0xff]  ;;  %v197_v24 = vld [vmem:[%s2447_s1 + $0x4d8] sm:$0xff]  ;;  %v196_v28 = vld [vmem:[%s2447_s1 + $0x4d0] sm:$0xff] }
  0x34   :  { %1180 = vmatprep.subr.mxu1 %v162_v33  ;;  %1146 = vmatpush3.msra.mxu0 %v114_v34  ;;  %v214_v23 = vld [vmem:[%s2447_s1 + $0x560] sm:$0xff]  ;;  %v229_v25 = vld [vmem:[%s2447_s1 + $0x5d8] sm:$0xff]  ;;  %v228_v29 = vld [vmem:[%s2447_s1 + $0x5d0] sm:$0xff] }
  0x35   :  { %1181 = vmatpush3.msra.mxu1 %v146_v35  ;;  %1147 = vmatprep.subr.mxu0 %v129_v36  ;;  %v181_v26 = vld [vmem:[%s2447_s1 + $0x458] sm:$0xff]  ;;  %v180_v30 = vld [vmem:[%s2447_s1 + $0x450] sm:$0xff]  ;;  %v195_v32 = vld [vmem:[%s2447_s1 + $0x4c8] sm:$0xff] }
  0x36   :  { %1182 = vmatprep.subr.mxu1 %v161_v37  ;;  %1148 = vmatpush3.msra.mxu0 %v113_v38  ;;  %v213_v27 = vld [vmem:[%s2447_s1 + $0x558] sm:$0xff]  ;;  %v212_v31 = vld [vmem:[%s2447_s1 + $0x550] sm:$0xff]  ;;  %v227_v33 = vld [vmem:[%s2447_s1 + $0x5c8] sm:$0xff] }
  0x37   :  { %1183 = vmatpush3.msra.mxu1 %v145_v39  ;;  %1149 = vmatprep.subr.mxu0 %v128_v40  ;;  %v179_v34 = vld [vmem:[%s2447_s1 + $0x448] sm:$0xff]  ;;  %v194_v36 = vld [vmem:[%s2447_s1 + $0x4c0] sm:$0xff]  ;;  %v193_v40 = vld [vmem:[%s2447_s1 + $0x4b8] sm:$0xff] }
  0x38   :  { %1184 = vmatprep.subr.mxu1 %v160_v41  ;;  %1150 = vmatpush3.msra.mxu0 %v112_v42  ;;  %v211_v35 = vld [vmem:[%s2447_s1 + $0x548] sm:$0xff]  ;;  %v226_v37 = vld [vmem:[%s2447_s1 + $0x5c0] sm:$0xff]  ;;  %v225_v41 = vld [vmem:[%s2447_s1 + $0x5b8] sm:$0xff] }
  0x39   :  { %1185 = vmatpush3.msra.mxu1 %v144_v43  ;;  %1151 = vmatprep.subr.mxu0 %v127_v44  ;;  %v178_v38 = vld [vmem:[%s2447_s1 + $0x440] sm:$0xff]  ;;  %v177_v42 = vld [vmem:[%s2447_s1 + $0x438] sm:$0xff]  ;;  %v192_v44 = vld [vmem:[%s2447_s1 + $0x4b0] sm:$0xff] }
  0x3a   :  { %1186 = vmatprep.subr.mxu1 %v159_v45  ;;  %1152 = vmatpush3.msra.mxu0 %v111_v46  ;;  %v210_v39 = vld [vmem:[%s2447_s1 + $0x540] sm:$0xff]  ;;  %v209_v43 = vld [vmem:[%s2447_s1 + $0x538] sm:$0xff]  ;;  %v224_v45 = vld [vmem:[%s2447_s1 + $0x5b0] sm:$0xff] }
  0x3b   :  { %1187 = vmatpush3.msra.mxu1 %v143_v47  ;;  %1153 = vmatprep.subr.mxu0 %v126_v48  ;;  %v176_v46 = vld [vmem:[%s2447_s1 + $0x430] sm:$0xff]  ;;  %v191_v48 = vld [vmem:[%s2447_s1 + $0x4a8] sm:$0xff] }
  0x3c   :  { %1188 = vmatprep.subr.mxu1 %v158_v49  ;;  %1154 = vmatpush3.msra.mxu0 %v110_v50  ;;  %v208_v47 = vld [vmem:[%s2447_s1 + $0x530] sm:$0xff]  ;;  %v223_v49 = vld [vmem:[%s2447_s1 + $0x5a8] sm:$0xff] }
  0x3d   :  { %1189 = vmatpush3.msra.mxu1 %v142_v51  ;;  %1155 = vmatprep.subr.mxu0 %v125_v52  ;;  %v175_v50 = vld [vmem:[%s2447_s1 + $0x428] sm:$0xff]  ;;  %v190_v52 = vld [vmem:[%s2447_s1 + $0x4a0] sm:$0xff] }
  0x3e   :  { %1190 = vmatprep.subr.mxu1 %v157_v53  ;;  %1156 = vmatpush3.msra.mxu0 %v109_v54  ;;  %v207_v51 = vld [vmem:[%s2447_s1 + $0x528] sm:$0xff]  ;;  %v222_v53 = vld [vmem:[%s2447_s1 + $0x5a0] sm:$0xff] }
  0x3f   :  { %1191 = vmatpush3.msra.mxu1 %v141_v55  ;;  %1157 = vmatprep.subr.mxu0 %v124_v56  ;;  %v174_v54 = vld [vmem:[%s2447_s1 + $0x420] sm:$0xff]  ;;  %v189_v56 = vld [vmem:[%s2447_s1 + $0x498] sm:$0xff] }
  0x40   :  { %1192 = vmatprep.subr.mxu1 %v156_v57  ;;  %1158 = vmatpush3.msra.mxu0 %v108_v58  ;;  %v206_v55 = vld [vmem:[%s2447_s1 + $0x520] sm:$0xff]  ;;  %v221_v57 = vld [vmem:[%s2447_s1 + $0x598] sm:$0xff] }
  0x41   :  { %1193 = vmatpush3.msra.mxu1 %v140_v59  ;;  %1159 = vmatprep.subr.mxu0 %v123_v60  ;;  %v173_v58 = vld [vmem:[%s2447_s1 + $0x418] sm:$0xff]  ;;  %v188_v60 = vld [vmem:[%s2447_s1 + $0x490] sm:$0xff] }
  0x42   :  { %1194 = vmatprep.subr.mxu1 %v155_v61  ;;  %1160 = vmatpush3.msra.mxu0 %v107_v62  ;;  %v205_v59 = vld [vmem:[%s2447_s1 + $0x518] sm:$0xff]  ;;  %v220_v61 = vld [vmem:[%s2447_s1 + $0x590] sm:$0xff] }
  0x43   :  { %1195 = vmatpush3.msra.mxu1 %v139_v63  ;;  %1161 = vmatprep.subr.mxu0 %v122_v0  ;;  %v172_v62 = vld [vmem:[%s2447_s1 + $0x410] sm:$0xff]  ;;  %v187_v0 = vld [vmem:[%s2447_s1 + $0x488] sm:$0xff] }
  0x44   :  { %1196 = vmatprep.subr.mxu1 %v154_v1  ;;  %1162 = vmatpush3.msra.mxu0 %v106_v2  ;;  %v204_v63 = vld [vmem:[%s2447_s1 + $0x510] sm:$0xff]  ;;  %v219_v1 = vld [vmem:[%s2447_s1 + $0x588] sm:$0xff] }
  0x45   :  { %509 = vmatprep.mubr.f32.mxu0 %v31_v3  ;;  %1197 = vmatpush3.msra.mxu1 %v138_v4  ;;  %v171_v2 = vld [vmem:[%s2447_s1 + $0x408] sm:$0xff]  ;;  %v186_v4 = vld [vmem:[%s2447_s1 + $0x480] sm:$0xff] }
  0x46   :  { %510 = vmatmul.mubr.f32.vlgmr.msra.gmra.mxu0 %v30_v5  ;;  %579 = vmatprep.mubr.f32.mxu1 %v33_v6  ;;  %v203_v3 = vld [vmem:[%s2447_s1 + $0x508] sm:$0xff]  ;;  %v218_v5 = vld [vmem:[%s2447_s1 + $0x580] sm:$0xff] }
  0x47   :  { %1201 = vmatprep.subr.mxu0 %v201_v7  ;;  %1236 = vmatprep.subr.mxu1 %v233_v8  ;;  %v170_v6 = vld [vmem:[%s2447_s1 + $0x400] sm:$0xff]  ;;  %v35_v7 = vld [vmem:[%s2448_s0 + $0x48] sm:$0xff] }
  0x48   :  { %580 = vmatmul.mubr.f32.vlgmr.msra.gmra.mxu1 %v32_v9  ;;  %1202 = vmatpush3.msra.mxu0 %v185_v10  ;;  %v202_v8 = vld [vmem:[%s2447_s1 + $0x500] sm:$0xff]  ;;  %v37_v10 = vld [vmem:[%s2448_s0 + $0x58] sm:$0xff] }
  0x49   :  { %1237 = vmatpush3.msra.mxu1 %v217_v11  ;;  %1203 = vmatprep.subr.mxu0 %v200_v12  ;;  %v34_v9 = vld [vmem:[%s2448_s0 + $0x40] sm:$0xff]  ;;  %v265_v11 = vld [vmem:[%s2447_s1 + $0x6f8] sm:$0xff] }
  0x4a   :  { %1238 = vmatprep.subr.mxu1 %v232_v13  ;;  %1204 = vmatpush3.msra.mxu0 %v184_v14  ;;  %v297_v12 = vld [vmem:[%s2447_s1 + $0x7f8] sm:$0xff]  ;;  %v36_v13 = vld [vmem:[%s2448_s0 + $0x50] sm:$0xff] }
  0x4b   :  { %1239 = vmatpush3.msra.mxu1 %v216_v15  ;;  %1205 = vmatprep.subr.mxu0 %v199_v16  ;;  %v249_v14 = vld [vmem:[%s2447_s1 + $0x678] sm:$0xff]  ;;  %v264_v16 = vld [vmem:[%s2447_s1 + $0x6f0] sm:$0xff] }
  0x4c   :  { %1240 = vmatprep.subr.mxu1 %v231_v17  ;;  %1206 = vmatpush3.msra.mxu0 %v183_v18  ;;  %v281_v15 = vld [vmem:[%s2447_s1 + $0x778] sm:$0xff]  ;;  %v296_v17 = vld [vmem:[%s2447_s1 + $0x7f0] sm:$0xff] }
  0x4d   :  { %1241 = vmatpush3.msra.mxu1 %v215_v19  ;;  %1207 = vmatprep.subr.mxu0 %v198_v20  ;;  %v248_v18 = vld [vmem:[%s2447_s1 + $0x670] sm:$0xff]  ;;  %v263_v20 = vld [vmem:[%s2447_s1 + $0x6e8] sm:$0xff] }
  0x4e   :  { %1242 = vmatprep.subr.mxu1 %v230_v21  ;;  %1208 = vmatpush3.msra.mxu0 %v182_v22  ;;  %v280_v19 = vld [vmem:[%s2447_s1 + $0x770] sm:$0xff]  ;;  %v295_v21 = vld [vmem:[%s2447_s1 + $0x7e8] sm:$0xff] }
  0x4f   :  { %1243 = vmatpush3.msra.mxu1 %v214_v23  ;;  %1209 = vmatprep.subr.mxu0 %v197_v24  ;;  %v247_v22 = vld [vmem:[%s2447_s1 + $0x668] sm:$0xff]  ;;  %v262_v24 = vld [vmem:[%s2447_s1 + $0x6e0] sm:$0xff] }
  0x50   :  { %1244 = vmatprep.subr.mxu1 %v229_v25  ;;  %1210 = vmatpush3.msra.mxu0 %v181_v26  ;;  %v279_v23 = vld [vmem:[%s2447_s1 + $0x768] sm:$0xff]  ;;  %v294_v25 = vld [vmem:[%s2447_s1 + $0x7e0] sm:$0xff] }
  0x51   :  { %1245 = vmatpush3.msra.mxu1 %v213_v27  ;;  %1211 = vmatprep.subr.mxu0 %v196_v28  ;;  %v246_v26 = vld [vmem:[%s2447_s1 + $0x660] sm:$0xff]  ;;  %v261_v28 = vld [vmem:[%s2447_s1 + $0x6d8] sm:$0xff] }
  0x52   :  { %1246 = vmatprep.subr.mxu1 %v228_v29  ;;  %1212 = vmatpush3.msra.mxu0 %v180_v30  ;;  %v278_v27 = vld [vmem:[%s2447_s1 + $0x760] sm:$0xff]  ;;  %v293_v29 = vld [vmem:[%s2447_s1 + $0x7d8] sm:$0xff] }
  0x53   :  { %1247 = vmatpush3.msra.mxu1 %v212_v31  ;;  %1213 = vmatprep.subr.mxu0 %v195_v32  ;;  %v245_v30 = vld [vmem:[%s2447_s1 + $0x658] sm:$0xff]  ;;  %v260_v32 = vld [vmem:[%s2447_s1 + $0x6d0] sm:$0xff] }
  0x54   :  { %1248 = vmatprep.subr.mxu1 %v227_v33  ;;  %1214 = vmatpush3.msra.mxu0 %v179_v34  ;;  %v277_v31 = vld [vmem:[%s2447_s1 + $0x758] sm:$0xff]  ;;  %v292_v33 = vld [vmem:[%s2447_s1 + $0x7d0] sm:$0xff] }
  0x55   :  { %1249 = vmatpush3.msra.mxu1 %v211_v35  ;;  %1215 = vmatprep.subr.mxu0 %v194_v36  ;;  %v244_v34 = vld [vmem:[%s2447_s1 + $0x650] sm:$0xff]  ;;  %v259_v36 = vld [vmem:[%s2447_s1 + $0x6c8] sm:$0xff] }
  0x56   :  { %1250 = vmatprep.subr.mxu1 %v226_v37  ;;  %1216 = vmatpush3.msra.mxu0 %v178_v38  ;;  %v276_v35 = vld [vmem:[%s2447_s1 + $0x750] sm:$0xff]  ;;  %v291_v37 = vld [vmem:[%s2447_s1 + $0x7c8] sm:$0xff] }
  0x57   :  { %1251 = vmatpush3.msra.mxu1 %v210_v39  ;;  %1217 = vmatprep.subr.mxu0 %v193_v40  ;;  %v243_v38 = vld [vmem:[%s2447_s1 + $0x648] sm:$0xff]  ;;  %v258_v40 = vld [vmem:[%s2447_s1 + $0x6c0] sm:$0xff] }
  0x58   :  { %1252 = vmatprep.subr.mxu1 %v225_v41  ;;  %1218 = vmatpush3.msra.mxu0 %v177_v42  ;;  %v275_v39 = vld [vmem:[%s2447_s1 + $0x748] sm:$0xff]  ;;  %v290_v41 = vld [vmem:[%s2447_s1 + $0x7c0] sm:$0xff] }
  0x59   :  { %1253 = vmatpush3.msra.mxu1 %v209_v43  ;;  %1219 = vmatprep.subr.mxu0 %v192_v44  ;;  %v242_v42 = vld [vmem:[%s2447_s1 + $0x640] sm:$0xff]  ;;  %v257_v44 = vld [vmem:[%s2447_s1 + $0x6b8] sm:$0xff] }
  0x5a   :  { %1254 = vmatprep.subr.mxu1 %v224_v45  ;;  %1220 = vmatpush3.msra.mxu0 %v176_v46  ;;  %v274_v43 = vld [vmem:[%s2447_s1 + $0x740] sm:$0xff]  ;;  %v289_v45 = vld [vmem:[%s2447_s1 + $0x7b8] sm:$0xff] }
  0x5b   :  { %1255 = vmatpush3.msra.mxu1 %v208_v47  ;;  %1221 = vmatprep.subr.mxu0 %v191_v48  ;;  %v241_v46 = vld [vmem:[%s2447_s1 + $0x638] sm:$0xff]  ;;  %v256_v48 = vld [vmem:[%s2447_s1 + $0x6b0] sm:$0xff] }
  0x5c   :  { %1256 = vmatprep.subr.mxu1 %v223_v49  ;;  %1222 = vmatpush3.msra.mxu0 %v175_v50  ;;  %v273_v47 = vld [vmem:[%s2447_s1 + $0x738] sm:$0xff]  ;;  %v288_v49 = vld [vmem:[%s2447_s1 + $0x7b0] sm:$0xff] }
  0x5d   :  { %1257 = vmatpush3.msra.mxu1 %v207_v51  ;;  %1223 = vmatprep.subr.mxu0 %v190_v52  ;;  %v240_v50 = vld [vmem:[%s2447_s1 + $0x630] sm:$0xff]  ;;  %v255_v52 = vld [vmem:[%s2447_s1 + $0x6a8] sm:$0xff] }
  0x5e   :  { %1258 = vmatprep.subr.mxu1 %v222_v53  ;;  %1224 = vmatpush3.msra.mxu0 %v174_v54  ;;  %v272_v51 = vld [vmem:[%s2447_s1 + $0x730] sm:$0xff]  ;;  %v287_v53 = vld [vmem:[%s2447_s1 + $0x7a8] sm:$0xff] }
  0x5f   :  { %1259 = vmatpush3.msra.mxu1 %v206_v55  ;;  %1225 = vmatprep.subr.mxu0 %v189_v56  ;;  %v239_v54 = vld [vmem:[%s2447_s1 + $0x628] sm:$0xff]  ;;  %v254_v56 = vld [vmem:[%s2447_s1 + $0x6a0] sm:$0xff] }
  0x60   :  { %1260 = vmatprep.subr.mxu1 %v221_v57  ;;  %1226 = vmatpush3.msra.mxu0 %v173_v58  ;;  %v271_v55 = vld [vmem:[%s2447_s1 + $0x728] sm:$0xff]  ;;  %v286_v57 = vld [vmem:[%s2447_s1 + $0x7a0] sm:$0xff] }
  0x61   :  { %1261 = vmatpush3.msra.mxu1 %v205_v59  ;;  %1227 = vmatprep.subr.mxu0 %v188_v60  ;;  %v238_v58 = vld [vmem:[%s2447_s1 + $0x620] sm:$0xff]  ;;  %v253_v60 = vld [vmem:[%s2447_s1 + $0x698] sm:$0xff] }
  0x62   :  { %1262 = vmatprep.subr.mxu1 %v220_v61  ;;  %1228 = vmatpush3.msra.mxu0 %v172_v62  ;;  %v270_v59 = vld [vmem:[%s2447_s1 + $0x720] sm:$0xff]  ;;  %v285_v61 = vld [vmem:[%s2447_s1 + $0x798] sm:$0xff] }
  0x63   :  { %1263 = vmatpush3.msra.mxu1 %v204_v63  ;;  %1229 = vmatprep.subr.mxu0 %v187_v0  ;;  %v237_v62 = vld [vmem:[%s2447_s1 + $0x618] sm:$0xff]  ;;  %v252_v0 = vld [vmem:[%s2447_s1 + $0x690] sm:$0xff] }
  0x64   :  { %1264 = vmatprep.subr.mxu1 %v219_v1  ;;  %1230 = vmatpush3.msra.mxu0 %v171_v2  ;;  %v269_v63 = vld [vmem:[%s2447_s1 + $0x718] sm:$0xff]  ;;  %v284_v1 = vld [vmem:[%s2447_s1 + $0x790] sm:$0xff] }
  0x65   :  { %1265 = vmatpush3.msra.mxu1 %v203_v3  ;;  %1231 = vmatprep.subr.mxu0 %v186_v4  ;;  %v236_v2 = vld [vmem:[%s2447_s1 + $0x610] sm:$0xff]  ;;  %v251_v4 = vld [vmem:[%s2447_s1 + $0x688] sm:$0xff] }
  0x66   :  { %1266 = vmatprep.subr.mxu1 %v218_v5  ;;  %1232 = vmatpush3.msra.mxu0 %v170_v6  ;;  %v268_v3 = vld [vmem:[%s2447_s1 + $0x710] sm:$0xff]  ;;  %v283_v5 = vld [vmem:[%s2447_s1 + $0x788] sm:$0xff] }
  0x67   :  { %649 = vmatprep.mubr.f32.mxu0 %v35_v7  ;;  %1267 = vmatpush3.msra.mxu1 %v202_v8  ;;  %v235_v6 = vld [vmem:[%s2447_s1 + $0x608] sm:$0xff]  ;;  %v250_v8 = vld [vmem:[%s2447_s1 + $0x680] sm:$0xff] }
  0x68   :  { %650 = vmatmul.mubr.f32.vlgmr.msra.gmra.mxu0 %v34_v9  ;;  %719 = vmatprep.mubr.f32.mxu1 %v37_v10  ;;  %v267_v7 = vld [vmem:[%s2447_s1 + $0x708] sm:$0xff]  ;;  %v282_v9 = vld [vmem:[%s2447_s1 + $0x780] sm:$0xff] }
  0x69   :  { %1271 = vmatprep.subr.mxu0 %v265_v11  ;;  %1306 = vmatprep.subr.mxu1 %v297_v12  ;;  %v234_v10 = vld [vmem:[%s2447_s1 + $0x600] sm:$0xff]  ;;  %v39_v11 = vld [vmem:[%s2448_s0 + $0x68] sm:$0xff] }
  0x6a   :  { %720 = vmatmul.mubr.f32.vlgmr.msra.gmra.mxu1 %v36_v13  ;;  %1272 = vmatpush3.msra.mxu0 %v249_v14  ;;  %v266_v12 = vld [vmem:[%s2447_s1 + $0x700] sm:$0xff]  ;;  %v41_v13 = vld [vmem:[%s2448_s0 + $0x78] sm:$0xff] }
  0x6b   :  { %1307 = vmatpush3.msra.mxu1 %v281_v15  ;;  %1273 = vmatprep.subr.mxu0 %v264_v16  ;;  %v38_v14 = vld [vmem:[%s2448_s0 + $0x60] sm:$0xff]  ;;  %v40_v15 = vld [vmem:[%s2448_s0 + $0x70] sm:$0xff]  ;;  %v1447_v16 = vmov 0.0  }
  0x6c   :  { %1308 = vmatprep.subr.mxu1 %v296_v17  ;;  %1274 = vmatpush3.msra.mxu0 %v248_v18  ;;  %v881_v17 = vld [vmem:[%s2449_s3 + $0x78] sm:$0xff]  ;;  %v880_v18 = vld [vmem:[%s2449_s3 + $0x70] sm:$0xff] }
  0x6d   :  { %1309 = vmatpush3.msra.mxu1 %v280_v19  ;;  %1275 = vmatprep.subr.mxu0 %v263_v20  ;;  %v879_v19 = vld [vmem:[%s2449_s3 + $0x68] sm:$0xff]  ;;  %v878_v20 = vld [vmem:[%s2449_s3 + $0x60] sm:$0xff] }
  0x6e   :  { %1310 = vmatprep.subr.mxu1 %v295_v21  ;;  %1276 = vmatpush3.msra.mxu0 %v247_v22  ;;  %v877_v21 = vld [vmem:[%s2449_s3 + $0x58] sm:$0xff]  ;;  %v876_v22 = vld [vmem:[%s2449_s3 + $0x50] sm:$0xff] }
  0x6f   :  { %1311 = vmatpush3.msra.mxu1 %v279_v23  ;;  %1277 = vmatprep.subr.mxu0 %v262_v24  ;;  %v875_v23 = vld [vmem:[%s2449_s3 + $0x48] sm:$0xff]  ;;  %v874_v24 = vld [vmem:[%s2449_s3 + $0x40] sm:$0xff] }
  0x70   :  { %1312 = vmatprep.subr.mxu1 %v294_v25  ;;  %1278 = vmatpush3.msra.mxu0 %v246_v26  ;;  %v873_v25 = vld [vmem:[%s2449_s3 + $0x38] sm:$0xff]  ;;  %v872_v26 = vld [vmem:[%s2449_s3 + $0x30] sm:$0xff] }
  0x71   :  { %1313 = vmatpush3.msra.mxu1 %v278_v27  ;;  %1279 = vmatprep.subr.mxu0 %v261_v28  ;;  %v871_v27 = vld [vmem:[%s2449_s3 + $0x28] sm:$0xff]  ;;  %v870_v28 = vld [vmem:[%s2449_s3 + $0x20] sm:$0xff] }
  0x72   :  { %1314 = vmatprep.subr.mxu1 %v293_v29  ;;  %1280 = vmatpush3.msra.mxu0 %v245_v30  ;;  %v869_v29 = vld [vmem:[%s2449_s3 + $0x18] sm:$0xff]  ;;  %v868_v30 = vld [vmem:[%s2449_s3 + $0x10] sm:$0xff] }
  0x73   :  { %1315 = vmatpush3.msra.mxu1 %v277_v31  ;;  %1281 = vmatprep.subr.mxu0 %v260_v32  ;;  %v867_v31 = vld [vmem:[%s2449_s3 + $0x8] sm:$0xff]  ;;  %v866_v32 = vld [vmem:[%s2449_s3] sm:$0xff] }
  0x74   :  { %1316 = vmatprep.subr.mxu1 %v292_v33  ;;  %1282 = vmatpush3.msra.mxu0 %v244_v34  ;;  %v975_v33 = vld [vmem:[%s2450_s5 + $0x78] sm:$0xff]  ;;  %v974_v34 = vld [vmem:[%s2450_s5 + $0x70] sm:$0xff] }
  0x75   :  { %1317 = vmatpush3.msra.mxu1 %v276_v35  ;;  %1283 = vmatprep.subr.mxu0 %v259_v36  ;;  %v973_v35 = vld [vmem:[%s2450_s5 + $0x68] sm:$0xff]  ;;  %v972_v36 = vld [vmem:[%s2450_s5 + $0x60] sm:$0xff] }
  0x76   :  { %1318 = vmatprep.subr.mxu1 %v291_v37  ;;  %1284 = vmatpush3.msra.mxu0 %v243_v38  ;;  %v971_v37 = vld [vmem:[%s2450_s5 + $0x58] sm:$0xff]  ;;  %v970_v38 = vld [vmem:[%s2450_s5 + $0x50] sm:$0xff] }
  0x77   :  { %1319 = vmatpush3.msra.mxu1 %v275_v39  ;;  %1285 = vmatprep.subr.mxu0 %v258_v40  ;;  %v969_v39 = vld [vmem:[%s2450_s5 + $0x48] sm:$0xff]  ;;  %v968_v40 = vld [vmem:[%s2450_s5 + $0x40] sm:$0xff] }
  0x78   :  { %1320 = vmatprep.subr.mxu1 %v290_v41  ;;  %1286 = vmatpush3.msra.mxu0 %v242_v42  ;;  %v967_v41 = vld [vmem:[%s2450_s5 + $0x38] sm:$0xff]  ;;  %v966_v42 = vld [vmem:[%s2450_s5 + $0x30] sm:$0xff] }
  0x79   :  { %1321 = vmatpush3.msra.mxu1 %v274_v43  ;;  %1287 = vmatprep.subr.mxu0 %v257_v44  ;;  %v965_v43 = vld [vmem:[%s2450_s5 + $0x28] sm:$0xff]  ;;  %v964_v44 = vld [vmem:[%s2450_s5 + $0x20] sm:$0xff] }
  0x7a   :  { %1322 = vmatprep.subr.mxu1 %v289_v45  ;;  %1288 = vmatpush3.msra.mxu0 %v241_v46  ;;  %v963_v45 = vld [vmem:[%s2450_s5 + $0x18] sm:$0xff] }
  0x7b   :  { %1323 = vmatpush3.msra.mxu1 %v273_v47  ;;  %1289 = vmatprep.subr.mxu0 %v256_v48 }
  0x7c   :  { %1324 = vmatprep.subr.mxu1 %v288_v49  ;;  %1290 = vmatpush3.msra.mxu0 %v240_v50 }
  0x7d   :  { %1325 = vmatpush3.msra.mxu1 %v272_v51  ;;  %1291 = vmatprep.subr.mxu0 %v255_v52  ;;  %v1058_v51 = vld [vmem:[%s2451_s2] ss:$0 sm:$0xff] }
  0x7e   :  { %1326 = vmatprep.subr.mxu1 %v287_v53  ;;  %1292 = vmatpush3.msra.mxu0 %v239_v54 }
  0x7f   :  { %1327 = vmatpush3.msra.mxu1 %v271_v55  ;;  %1293 = vmatprep.subr.mxu0 %v254_v56 }
  0x80   :  { %1328 = vmatprep.subr.mxu1 %v286_v57  ;;  %1294 = vmatpush3.msra.mxu0 %v238_v58 }
  0x81   :  { %1329 = vmatpush3.msra.mxu1 %v270_v59  ;;  %1295 = vmatprep.subr.mxu0 %v253_v60 }
  0x82   :  { %1330 = vmatprep.subr.mxu1 %v285_v61  ;;  %1296 = vmatpush3.msra.mxu0 %v237_v62 }
  0x83   :  { %1331 = vmatpush3.msra.mxu1 %v269_v63  ;;  %1297 = vmatprep.subr.mxu0 %v252_v0 }
  0x84   :  { %1332 = vmatprep.subr.mxu1 %v284_v1  ;;  %1298 = vmatpush3.msra.mxu0 %v236_v2 }
  0x85   :  { %1333 = vmatpush3.msra.mxu1 %v268_v3  ;;  %1299 = vmatprep.subr.mxu0 %v251_v4 }
  0x86   :  { %1334 = vmatprep.subr.mxu1 %v283_v5  ;;  %1300 = vmatpush3.msra.mxu0 %v235_v6 }
  0x87   :  { %1335 = vmatpush3.msra.mxu1 %v267_v7  ;;  %1301 = vmatprep.subr.mxu0 %v250_v8 }
  0x88   :  { %1336 = vmatprep.subr.mxu1 %v282_v9  ;;  %1302 = vmatpush3.msra.mxu0 %v234_v10 }
  0x89   :  { %789 = vmatprep.mubr.f32.mxu0 %v39_v11  ;;  %1337 = vmatpush3.msra.mxu1 %v266_v12 }
  0x8a   :  { %859 = vmatprep.mubr.f32.mxu1 %v41_v13  ;;  %790 = vmatmul.mubr.f32.vlgmr.msra.gmra.mxu0 %v38_v14 }
  0x8b   :  { %860 = vmatmul.mubr.f32.vlgmr.msra.gmra.mxu1 %v40_v15  ;;  %1375 = vmatprep.subr.mxu0 %v1447_v16 }
  0x8c   :  { %1410 = vmatprep.subr.mxu1 %v1447_v16  ;;  %1376 = vmatpush3.msra.mxu0 %v881_v17  ;;  %v962_v17 = vld [vmem:[%s2450_s5 + $0x10] sm:$0xff] }
  0x8d   :  { %1377 = vmatprep.subr.mxu0 %v1447_v16  ;;  %1407 = vmatprep.mubr.msk.f32.mxu0 %vm1448_vm0, %v1447_v16 }
  0x8e   :  { %1378 = vmatpush3.msra.mxu0 %v880_v18  ;;  %1442 = vmatprep.mubr.msk.f32.mxu1 %vm1448_vm0, %v1447_v16  ;;  %v961_v18 = vld [vmem:[%s2450_s5 + $0x8] sm:$0xff] }
  0x8f   :  { %1379 = vmatprep.subr.mxu0 %v1447_v16  ;;  %1411 = vmatpush3.msra.mxu1 %v975_v33 }
  0x90   :  { %1380 = vmatpush3.msra.mxu0 %v879_v19  ;;  %1412 = vmatprep.subr.mxu1 %v1447_v16  ;;  %v960_v19 = vld [vmem:[%s2450_s5] sm:$0xff] }
  0x91   :  { %1381 = vmatprep.subr.mxu0 %v1447_v16  ;;  %1413 = vmatpush3.msra.mxu1 %v974_v34 }
  0x92   :  { %1382 = vmatpush3.msra.mxu0 %v878_v20  ;;  %1414 = vmatprep.subr.mxu1 %v1447_v16  ;;  %v1059_v20 = vld [vmem:[%s2452_s4] ss:$0 sm:$0xff] }
  0x93   :  { %1383 = vmatprep.subr.mxu0 %v1447_v16  ;;  %1415 = vmatpush3.msra.mxu1 %v973_v35 }
  0x94   :  { %1384 = vmatpush3.msra.mxu0 %v877_v21  ;;  %1416 = vmatprep.subr.mxu1 %v1447_v16 }
  0x95   :  { %1385 = vmatprep.subr.mxu0 %v1447_v16  ;;  %1417 = vmatpush3.msra.mxu1 %v972_v36 }
  0x96   :  { %1386 = vmatpush3.msra.mxu0 %v876_v22  ;;  %1418 = vmatprep.subr.mxu1 %v1447_v16 }
  0x97   :  { %1387 = vmatprep.subr.mxu0 %v1447_v16  ;;  %1419 = vmatpush3.msra.mxu1 %v971_v37 }
  0x98   :  { %1388 = vmatpush3.msra.mxu0 %v875_v23  ;;  %1420 = vmatprep.subr.mxu1 %v1447_v16 }
  0x99   :  { %1389 = vmatprep.subr.mxu0 %v1447_v16  ;;  %1421 = vmatpush3.msra.mxu1 %v970_v38 }
  0x9a   :  { %1390 = vmatpush3.msra.mxu0 %v874_v24  ;;  %1422 = vmatprep.subr.mxu1 %v1447_v16 }
  0x9b   :  { %1391 = vmatprep.subr.mxu0 %v1447_v16  ;;  %1423 = vmatpush3.msra.mxu1 %v969_v39 }
  0x9c   :  { %1392 = vmatpush3.msra.mxu0 %v873_v25  ;;  %1424 = vmatprep.subr.mxu1 %v1447_v16  ;;  %v1060_v25 = vld [vmem:[%s2453_s6] ss:$0 sm:$0xff] }
  0x9d   :  { %1393 = vmatprep.subr.mxu0 %v1447_v16  ;;  %1425 = vmatpush3.msra.mxu1 %v968_v40 }
  0x9e   :  { %1394 = vmatpush3.msra.mxu0 %v872_v26  ;;  %1426 = vmatprep.subr.mxu1 %v1447_v16 }
  0x9f   :  { %1395 = vmatprep.subr.mxu0 %v1447_v16  ;;  %1427 = vmatpush3.msra.mxu1 %v967_v41 }
  0xa0   :  { %1396 = vmatpush3.msra.mxu0 %v871_v27  ;;  %1428 = vmatprep.subr.mxu1 %v1447_v16 }
  0xa1   :  { %1397 = vmatprep.subr.mxu0 %v1447_v16  ;;  %1429 = vmatpush3.msra.mxu1 %v966_v42 }
  0xa2   :  { %1398 = vmatpush3.msra.mxu0 %v870_v28  ;;  %1430 = vmatprep.subr.mxu1 %v1447_v16 }
  0xa3   :  { %1399 = vmatprep.subr.mxu0 %v1447_v16  ;;  %1431 = vmatpush3.msra.mxu1 %v965_v43 }
  0xa4   :  { %1400 = vmatpush3.msra.mxu0 %v869_v29  ;;  %1432 = vmatprep.subr.mxu1 %v1447_v16 }
  0xa5   :  { %1401 = vmatprep.subr.mxu0 %v1447_v16  ;;  %1433 = vmatpush3.msra.mxu1 %v964_v44 }
  0xa6   :  { %1402 = vmatpush3.msra.mxu0 %v868_v30  ;;  %1434 = vmatprep.subr.mxu1 %v1447_v16 }
  0xa7   :  { %1403 = vmatprep.subr.mxu0 %v1447_v16  ;;  %1435 = vmatpush3.msra.mxu1 %v963_v45 }
  0xa8   :  { %1404 = vmatpush3.msra.mxu0 %v867_v31  ;;  %1436 = vmatprep.subr.mxu1 %v1447_v16 }
  0xa9   :  { %1405 = vmatprep.subr.mxu0 %v1447_v16  ;;  %1437 = vmatpush3.msra.mxu1 %v962_v17 }
  0xaa   :  { %1406 = vmatpush3.msra.mxu0 %v866_v32  ;;  %1438 = vmatprep.subr.mxu1 %v1447_v16 }
  0xab   :  { %1439 = vmatpush3.msra.mxu1 %v961_v18 }
  0xac   :  { %1440 = vmatprep.subr.mxu1 %v1447_v16 }
  0xad   :  { %1441 = vmatpush3.msra.mxu1 %v960_v19 }
  0xe4   :  { %v1093_v46 = vpop.f32.mrf.mxu0 }
  0xe6   :  { %v1128_v47 = vpop.f32.mrf.mxu1  ;;  %v1094_v48 = vpop.f32.mrf.mxu0 }
  0xe7   :  { %v1095_v50 = vadd.f32 %v1094_v48, %v1093_v46 }
  0xe8   :  { %v1129_v52 = vpop.f32.mrf.mxu1 }
  0xe9   :  { %v372_v55 = vadd.f32 %v1095_v50, %v1058_v51  ;;  %v1130_v56 = vadd.f32 %v1129_v52, %v1128_v47 }
  0xeb   :  { %v442_v60 = vadd.f32 %v1130_v56, %v372_v55 }
 0x106   :  { %v1163_v49 = vpop.f32.mrf.mxu0 }
 0x108   :  { %v1198_v53 = vpop.f32.mrf.mxu1  ;;  %v1164_v54 = vpop.f32.mrf.mxu0 }
 0x109   :  { %v1165_v58 = vadd.f32 %v1164_v54, %v1163_v49 }
 0x10a   :  { %v1199_v59 = vpop.f32.mrf.mxu1 }
 0x10b   :  { %v512_v63 = vadd.f32 %v1165_v58, %v442_v60  ;;  %v1200_v0 = vadd.f32 %v1199_v59, %v1198_v53 }
 0x10d   :  { %v582_v3 = vadd.f32 %v1200_v0, %v512_v63 }
 0x128   :  { %v1233_v57 = vpop.f32.mrf.mxu0 }
 0x12a   :  { %v1268_v61 = vpop.f32.mrf.mxu1  ;;  %v1234_v62 = vpop.f32.mrf.mxu0 }
 0x12b   :  { %v1235_v1 = vadd.f32 %v1234_v62, %v1233_v57 }
 0x12c   :  { %v1269_v2 = vpop.f32.mrf.mxu1 }
 0x12d   :  { %v652_v4 = vadd.f32 %v1235_v1, %v582_v3  ;;  %v1270_v5 = vadd.f32 %v1269_v2, %v1268_v61 }
 0x12f   :  { %v722_v10 = vadd.f32 %v1270_v5, %v652_v4 }
 0x14a   :  { %v1303_v6 = vpop.f32.mrf.mxu0 }
 0x14b   :  { %v1338_v7 = vpop.f32.mrf.mxu1 }
 0x14c   :  { %v1304_v8 = vpop.f32.mrf.mxu0 }
 0x14d   :  { %v1339_v9 = vpop.f32.mrf.mxu1  ;;  %v1305_v11 = vadd.f32 %v1304_v8, %v1303_v6 }
 0x14e   :  { %v1340_v13 = vadd.f32 %v1339_v9, %v1338_v7 }
 0x14f   :  { %v792_v12 = vadd.f32 %v1305_v11, %v722_v10 }
 0x151   :  { %v862_v14 = vadd.f32 %v1340_v13, %v792_v12 }
 0x153   :  { %v865_v15 = vmax.f32 %v862_v14, 0.0 }
 0x155   :  { %1408 = vmatmul.mubr.f32.vlgmr.msra.gmra.mxu0 %v865_v15 }
 0x215   :  { %v955_v21 = vpop.f32.mrf.mxu0 }
 0x216   :  { %v956_v22 = vadd.f32 %v1059_v20, %v955_v21 }
 0x217   :  { %v1409_v23 = vpop.f32.mrf.mxu0 }
 0x218   :  { %v959_v24 = vmax.f32 %v956_v22, 0.0 }
 0x21a   :  { %1443 = vmatmul.mubr.f32.vlgmr.msra.gmra.mxu1 %v959_v24 }
 0x2da   :  { %v1049_v26 = vpop.f32.mrf.mxu1 }
 0x2db   :  { %v1050_v16 = vadd.f32 %v1060_v25, %v1049_v26 }
 0x2dc   :  { %v1444_v27 = vpop.f32.mrf.mxu1 }
 0x2dd   :  { %1053 = vst [vmem:[%s2454_s7] sm:$0xff] %v1050_v16 }

</bundles_post_ra>
